<compile_context>
chip_gen: v7x
topology: tpu7x:2x2x1
jax: 0.10.0
libtpu: 0.0.40
codegen_flags: <defaults>
</compile_context>

<pallas_src>
import functools

import jax
import jax.numpy as jnp
from jax.experimental import pallas as pl
from jax.experimental.pallas import tpu as pltpu

# ---------------------------------------------------------------------------
# Small, BERT-consistent shapes.
B, S, H = 2, 8, 32
NUM_HEADS = 2
HEAD_DIM = H // NUM_HEADS
FF = 4 * H                    # 128 == lane width
VOCAB = 100
NUM_CLASSES = 4
PAD_C = 128                   # lane-dense padded logits width
LN_EPS = 1e-12
NEG_INF = -1e9                # scores / bias stay f32 (bf16 would overflow)

# Row layout of the packed vector operand `vecs` (shape (VEC_ROWS, FF) f32).
ROW_BQ = 0                    # rows 0..NH-1   : per-head q bias  (HEAD_DIM lanes)
ROW_BK = NUM_HEADS            # rows NH..2NH-1 : per-head k bias
ROW_BV = 2 * NUM_HEADS        # rows 2NH..3NH-1: per-head v bias
ROW_BO = 3 * NUM_HEADS        # 6 : attn output bias        (H lanes)
ROW_LN1G, ROW_LN1B = 7, 8     # LayerNorm 1 gamma / beta    (H lanes)
ROW_B1, ROW_B2 = 9, 10        # FFN biases                  (FF / H lanes)
ROW_LN2G, ROW_LN2B = 11, 12   # LayerNorm 2 gamma / beta    (H lanes)
ROW_BC = 13                   # classifier bias, zero-padded to PAD_C lanes
VEC_ROWS = 16                 # padded to a sublane multiple


def _layernorm(x, g, b):
    mu = jnp.mean(x, axis=-1, keepdims=True)
    var = jnp.mean((x - mu) ** 2, axis=-1, keepdims=True)
    return (x - mu) * jax.lax.rsqrt(var + LN_EPS) * g + b


# ---------------------------------------------------------------------------
# Pallas kernel: one grid step processes `bblk` batch elements (bblk*S rows).
def encoder_classifier_kernel(
    x_ref,        # (bblk*S, H)        f32   post-embedding activations
    mask_ref,     # (bblk, 1, S)       f32   1 = attend, 0 = masked
    w_attn_ref,   # (3*NH, H, Dh)      bf16  [q heads | k heads | v heads]
    wo_ref,       # (NH, Dh, H)        bf16
    w1_ref,       # (H, FF)            bf16
    w2_ref,       # (FF, H)            bf16
    wc_ref,       # (H, PAD_C)         bf16  zero-padded classifier weight
    vecs_ref,     # (VEC_ROWS, FF)     f32   packed biases / LN params
    out_ref,      # (bblk, 1, PAD_C)   f32   lane-dense padded logits
):
    rows = x_ref.shape[0]
    bblk = rows // S

    x = x_ref[...]                       # (rows, H) f32
    mask = mask_ref[...]                 # (bblk, 1, S) f32
    vecs = vecs_ref[...]                 # (VEC_ROWS, FF) f32
    x_bf = x.astype(jnp.bfloat16)
    scale = 1.0 / (HEAD_DIM ** 0.5)

    # ---- multi-head self attention (head axis leading: no lane slicing) ----
    attn_out = jnp.zeros((rows, H), jnp.float32)
    for h in range(NUM_HEADS):
        qh = jnp.dot(x_bf, w_attn_ref[ROW_BQ + h],
                     preferred_element_type=jnp.float32) + vecs[ROW_BQ + h, :HEAD_DIM]
        kh = jnp.dot(x_bf, w_attn_ref[ROW_BK + h],
                     preferred_element_type=jnp.float32) + vecs[ROW_BK + h, :HEAD_DIM]
        vh = jnp.dot(x_bf, w_attn_ref[ROW_BV + h],
                     preferred_element_type=jnp.float32) + vecs[ROW_BV + h, :HEAD_DIM]

        # Attention is per batch element (sublane-aligned row blocks of size S).
        ctx_rows = []
        for b in range(bblk):
            r = slice(b * S, (b + 1) * S)
            qb, kb, vb = qh[r], kh[r], vh[r]                     # (S, Dh) f32
            bias_b = (1.0 - mask[b, 0, :]) * NEG_INF             # (S,)
            s_bh = jnp.dot(qb, kb.T, preferred_element_type=jnp.float32)
            s_bh = s_bh * scale + bias_b[None, :]
            s_bh = s_bh - jnp.max(s_bh, axis=-1, keepdims=True)
            p = jnp.exp(s_bh)
            inv = pl.reciprocal(jnp.sum(p, axis=-1, keepdims=True), approx=True)
            ctx_b = jnp.dot(p.astype(jnp.bfloat16), vb.astype(jnp.bfloat16),
                            preferred_element_type=jnp.float32) * inv
            ctx_rows.append(ctx_b)
        ctx_h = jnp.concatenate(ctx_rows, axis=0)                # (rows, Dh)

        # Head-summed output projection: no lane-axis concat over heads.
        attn_out = attn_out + jnp.dot(ctx_h.astype(jnp.bfloat16), wo_ref[h],
                                      preferred_element_type=jnp.float32)
    attn_out = attn_out + vecs[ROW_BO, :H]

    h1 = _layernorm(x + attn_out, vecs[ROW_LN1G, :H], vecs[ROW_LN1B, :H])

    # ---- feed-forward (GELU) ------------------------------------------------
    ffn = jnp.dot(h1.astype(jnp.bfloat16), w1_ref[...],
                  preferred_element_type=jnp.float32) + vecs[ROW_B1, :]
    ffn = jax.nn.gelu(ffn, approximate=True)
    ffn = jnp.dot(ffn.astype(jnp.bfloat16), w2_ref[...],
                  preferred_element_type=jnp.float32) + vecs[ROW_B2, :H]
    h2 = _layernorm(h1 + ffn, vecs[ROW_LN2G, :H], vecs[ROW_LN2B, :H])

    # ---- pooled_output = last_hidden_state[:, 0, :]; dropout = identity ----
    cls = jnp.concatenate([h2[b * S: b * S + 1, :] for b in range(bblk)], axis=0)
    logits = jnp.dot(cls.astype(jnp.bfloat16), wc_ref[...],
                     preferred_element_type=jnp.float32) + vecs[ROW_BC, :]
    out_ref[...] = logits.reshape(bblk, 1, PAD_C)


# ---------------------------------------------------------------------------
def _pick_batch_block():
    """v7x has 2 TensorCores -> keep a parallel batch grid axis; 1-TC chips
    (v5e / v6e) fuse the whole batch into a single grid step."""
    try:
        kind = jax.devices()[0].device_kind.lower()
    except Exception:
        kind = ""
    if "v7" in kind or "7x" in kind:
        return 1
    return B


@jax.jit
def text_classifier_forward(input_ids, attention_mask, kparams):
    # Embedding + embedding LayerNorm: plain-JAX glue (token gather).
    emb = kparams["word_emb"][input_ids] + kparams["pos_emb"][None, :, :]
    x = _layernorm(emb, kparams["emb_ln_g"], kparams["emb_ln_b"])
    x = x.reshape(B * S, H).astype(jnp.float32)                  # row-batched
    mask = attention_mask.astype(jnp.float32)[:, None, :]        # (B, 1, S)

    bblk = _pick_batch_block()
    grid = (B // bblk,)

    weights = (kparams["w_attn"], kparams["wo"], kparams["w1"],
               kparams["w2"], kparams["wc_pad"], kparams["vecs"])

    in_specs = [
        pl.BlockSpec((bblk * S, H), lambda i: (i, 0)),           # activations
        pl.BlockSpec((bblk, 1, S), lambda i: (i, 0, 0)),         # attention mask
    ] + [
        pl.BlockSpec(w.shape, lambda i, _n=w.ndim: (0,) * _n)    # replicated weights
        for w in weights
    ]

    cost = pl.CostEstimate(flops=450_000, transcendentals=5_000,
                           bytes_accessed=80_000)

    logits_pad = pl.pallas_call(
        encoder_classifier_kernel,
        out_shape=jax.ShapeDtypeStruct((B, 1, PAD_C), jnp.float32),
        grid=grid,
        in_specs=in_specs,
        out_specs=pl.BlockSpec((bblk, 1, PAD_C), lambda i: (i, 0, 0)),
        compiler_params=pltpu.CompilerParams(dimension_semantics=("parallel",)),
        cost_estimate=cost,
    )(x, mask, *weights)

    return logits_pad[:, 0, :NUM_CLASSES]                        # (B, NUM_CLASSES)


# ---------------------------------------------------------------------------
# Parameter construction (canonical f32, (in, out) layout like x @ W + b) and
# one-time repacking into the kernel layout (per-head stacks, bf16, packed vecs).
def make_params(key):
    ks = jax.random.split(key, 24)
    std = 0.02

    def n(k, shape, s=std):
        return jax.random.normal(k, shape, jnp.float32) * s

    return {
        "word_emb": n(ks[0], (VOCAB, H)),
        "pos_emb":  n(ks[1], (S, H)),
        "emb_ln_g": 1.0 + n(ks[2], (H,), 0.1),
        "emb_ln_b": n(ks[3], (H,)),
        "wq": n(ks[4], (H, H)),  "bq": n(ks[5], (H,)),
        "wk": n(ks[6], (H, H)),  "bk": n(ks[7], (H,)),
        "wv": n(ks[8], (H, H)),  "bv": n(ks[9], (H,)),
        "wo": n(ks[10], (H, H)), "bo": n(ks[11], (H,)),
        "ln1_g": 1.0 + n(ks[12], (H,), 0.1), "ln1_b": n(ks[13], (H,)),
        "w1": n(ks[14], (H, FF)), "b1": n(ks[15], (FF,)),
        "w2": n(ks[16], (FF, H)), "b2": n(ks[17], (H,)),
        "ln2_g": 1.0 + n(ks[18], (H,), 0.1), "ln2_b": n(ks[19], (H,)),
        # PyTorch nn.Linear(H, NUM_CLASSES) weight is (C, H); stored transposed.
        "wc": n(ks[20], (H, NUM_CLASSES)), "bc": n(ks[21], (NUM_CLASSES,)),
    }


def prepare_kernel_params(p):
    def heads_in(w):                      # (H, H) -> (NH, H, HEAD_DIM)
        return jnp.transpose(w.reshape(H, NUM_HEADS, HEAD_DIM), (1, 0, 2))

    w_attn = jnp.concatenate(
        [heads_in(p["wq"]), heads_in(p["wk"]), heads_in(p["wv"])], axis=0
    ).astype(jnp.bfloat16)                                        # (3*NH, H, Dh)
    wo = p["wo"].reshape(NUM_HEADS, HEAD_DIM, H).astype(jnp.bfloat16)
    wc_pad = (jnp.zeros((H, PAD_C), jnp.float32)
              .at[:, :NUM_CLASSES].set(p["wc"])).astype(jnp.bfloat16)

    def row(v):
        return jnp.zeros((FF,), jnp.float32).at[: v.shape[0]].set(v)

    rows = [jnp.zeros((FF,), jnp.float32)] * VEC_ROWS
    bq = p["bq"].reshape(NUM_HEADS, HEAD_DIM)
    bk = p["bk"].reshape(NUM_HEADS, HEAD_DIM)
    bv = p["bv"].reshape(NUM_HEADS, HEAD_DIM)
    for h in range(NUM_HEADS):
        rows[ROW_BQ + h] = row(bq[h])
        rows[ROW_BK + h] = row(bk[h])
        rows[ROW_BV + h] = row(bv[h])
    rows[ROW_BO] = row(p["bo"])
    rows[ROW_LN1G], rows[ROW_LN1B] = row(p["ln1_g"]), row(p["ln1_b"])
    rows[ROW_B1], rows[ROW_B2] = row(p["b1"]), row(p["b2"])
    rows[ROW_LN2G], rows[ROW_LN2B] = row(p["ln2_g"]), row(p["ln2_b"])
    rows[ROW_BC] = row(p["bc"])
    vecs = jnp.stack(rows, axis=0)                                # (16, 128)

    return {
        "word_emb": p["word_emb"], "pos_emb": p["pos_emb"],
        "emb_ln_g": p["emb_ln_g"], "emb_ln_b": p["emb_ln_b"],
        "w_attn": w_attn, "wo": wo,
        "w1": p["w1"].astype(jnp.bfloat16), "w2": p["w2"].astype(jnp.bfloat16),
        "wc_pad": wc_pad, "vecs": vecs,
    }


# ---------------------------------------------------------------------------
# Pure-JAX f32 reference (same math, canonical layout) for correctness check.
def reference_forward(input_ids, attention_mask, p):
    emb = p["word_emb"][input_ids] + p["pos_emb"][None, :, :]
    x = _layernorm(emb, p["emb_ln_g"], p["emb_ln_b"])
    mask = attention_mask.astype(jnp.float32)
    bias = (1.0 - mask)[:, None, :] * NEG_INF
    scale = 1.0 / (HEAD_DIM ** 0.5)

    q = x @ p["wq"] + p["bq"]
    k = x @ p["wk"] + p["bk"]
    v = x @ p["wv"] + p["bv"]
    ctx_heads = []
    for h in range(NUM_HEADS):
        sl = slice(h * HEAD_DIM, (h + 1) * HEAD_DIM)
        s_ = jnp.einsum("bqd,bkd->bqk", q[..., sl], k[..., sl]) * scale + bias
        pr = jax.nn.softmax(s_, axis=-1)
        ctx_heads.append(jnp.einsum("bqk,bkd->bqd", pr, v[..., sl]))
    ctx = jnp.concatenate(ctx_heads, axis=-1)

    attn_out = ctx @ p["wo"] + p["bo"]
    h1 = _layernorm(x + attn_out, p["ln1_g"], p["ln1_b"])
    ffn = jax.nn.gelu(h1 @ p["w1"] + p["b1"], approximate=True)
    ffn = ffn @ p["w2"] + p["b2"]
    h2 = _layernorm(h1 + ffn, p["ln2_g"], p["ln2_b"])

    cls = h2[:, 0, :]                                            # CLS pooling
    return cls @ p["wc"] + p["bc"]                               # dropout = identity


# ---------------------------------------------------------------------------
if __name__ == "__main__":
    key = jax.random.PRNGKey(0)
    k_ids, k_params = jax.random.split(key)

    input_ids = jax.random.randint(k_ids, (B, S), 0, VOCAB, dtype=jnp.int32)
    # Second sample has its last 3 tokens masked out.
    attention_mask = jnp.array([[1] * S, [1] * (S - 3) + [0] * 3], dtype=jnp.int32)

    params = make_params(k_params)
    kparams = prepare_kernel_params(params)   # one-time repack (bf16 / packed)

    logits = text_classifier_forward(input_ids, attention_mask, kparams)
    logits = jax.block_until_ready(logits)

    ref = reference_forward(input_ids, attention_mask, params)
    assert logits.shape == (B, NUM_CLASSES)
    max_err = jnp.max(jnp.abs(logits - ref))
    assert jnp.allclose(logits, ref, atol=2e-2, rtol=2e-2), (
        f"mismatch: max abs err = {max_err}"
    )

    # TODO(synk): token-embedding gather stays in plain JAX (no tiled hot path).
    print("KERNEL_OK")
</pallas_src>

<mosaic_0001>
module attributes {stable_mosaic.version = 11 : i64} {
  func.func @encoder_classifier_kernel(%arg0: i32, %arg1: memref<16x32xf32, #tpu.memory_space<vmem>>, %arg2: memref<2x1x8xf32, #tpu.memory_space<vmem>>, %arg3: memref<6x32x16xbf16, #tpu.memory_space<vmem>>, %arg4: memref<2x16x32xbf16, #tpu.memory_space<vmem>>, %arg5: memref<32x128xbf16, #tpu.memory_space<vmem>>, %arg6: memref<128x32xbf16, #tpu.memory_space<vmem>>, %arg7: memref<32x128xbf16, #tpu.memory_space<vmem>>, %arg8: memref<16x128xf32, #tpu.memory_space<vmem>>, %arg9: memref<2x1x128xf32, #tpu.memory_space<vmem>>) attributes {dimension_semantics = [#tpu.dimension_semantics<parallel>], iteration_bounds = array<i64: 1>, scalar_prefetch = 0 : i64, scratch_operands = 0 : i64, tpu.core_type = #tpu.core_type<tc>, window_params = [{transform_indices = @transform_0, window_bounds = array<i64: 16, 32>}, {transform_indices = @transform_1, window_bounds = array<i64: 2, 1, 8>}, {pipeline_mode = #tpu.pipeline_mode<synchronous>, transform_indices = @transform_2, window_bounds = array<i64: 6, 32, 16>}, {pipeline_mode = #tpu.pipeline_mode<synchronous>, transform_indices = @transform_3, window_bounds = array<i64: 2, 16, 32>}, {pipeline_mode = #tpu.pipeline_mode<synchronous>, transform_indices = @transform_4, window_bounds = array<i64: 32, 128>}, {pipeline_mode = #tpu.pipeline_mode<synchronous>, transform_indices = @transform_5, window_bounds = array<i64: 128, 32>}, {pipeline_mode = #tpu.pipeline_mode<synchronous>, transform_indices = @transform_6, window_bounds = array<i64: 32, 128>}, {pipeline_mode = #tpu.pipeline_mode<synchronous>, transform_indices = @transform_7, window_bounds = array<i64: 16, 128>}, {transform_indices = @transform_8, window_bounds = array<i64: 2, 1, 128>}]} {
    %c0 = arith.constant 0 : index
    %c0_0 = arith.constant 0 : index
    %0 = vector.load %arg1[%c0, %c0_0] : memref<16x32xf32, #tpu.memory_space<vmem>>, vector<16x32xf32>
    %c0_1 = arith.constant 0 : index
    %c0_2 = arith.constant 0 : index
    %c0_3 = arith.constant 0 : index
    %1 = vector.load %arg2[%c0_1, %c0_2, %c0_3] : memref<2x1x8xf32, #tpu.memory_space<vmem>>, vector<2x1x8xf32>
    %c0_4 = arith.constant 0 : index
    %c0_5 = arith.constant 0 : index
    %2 = vector.load %arg8[%c0_4, %c0_5] : memref<16x128xf32, #tpu.memory_space<vmem>>, vector<16x128xf32>
    %3 = arith.truncf %0 : vector<16x32xf32> to vector<16x32xbf16>
    %cst = arith.constant 0.000000e+00 : f32
    %4 = vector.broadcast %cst : f32 to vector<16x32xf32>
    %c0_6 = arith.constant 0 : index
    %c0_7 = arith.constant 0 : index
    %c0_8 = arith.constant 0 : index
    %5 = vector.load %arg3[%c0_6, %c0_7, %c0_8] : memref<6x32x16xbf16, #tpu.memory_space<vmem>>, vector<1x32x16xbf16>
    %6 = vector.shape_cast %5 : vector<1x32x16xbf16> to vector<32x16xbf16>
    %cst_9 = arith.constant dense<0.000000e+00> : vector<16x16xf32>
    %7 = tpu.matmul %3, %6, %cst_9 {dimension_numbers = #tpu.dot_dimension_numbers<[1], [0], [0], [1], [0, 0, 1, 1], [], []>} : vector<16x32xbf16>, vector<32x16xbf16>, vector<16x16xf32> -> vector<16x16xf32>
    %8 = vector.extract_strided_slice %2 {offsets = [0, 0], sizes = [1, 16], strides = [1, 1]} : vector<16x128xf32> to vector<1x16xf32>
    %9 = vector.shape_cast %8 : vector<1x16xf32> to vector<16xf32>
    %10 = vector.shape_cast %9 : vector<16xf32> to vector<1x16xf32>
    %11 = vector.broadcast %10 : vector<1x16xf32> to vector<16x16xf32>
    %12 = arith.addf %7, %11 : vector<16x16xf32>
    %c2 = arith.constant 2 : index
    %c0_10 = arith.constant 0 : index
    %c0_11 = arith.constant 0 : index
    %13 = vector.load %arg3[%c2, %c0_10, %c0_11] : memref<6x32x16xbf16, #tpu.memory_space<vmem>>, vector<1x32x16xbf16>
    %14 = vector.shape_cast %13 : vector<1x32x16xbf16> to vector<32x16xbf16>
    %cst_12 = arith.constant dense<0.000000e+00> : vector<16x16xf32>
    %15 = tpu.matmul %3, %14, %cst_12 {dimension_numbers = #tpu.dot_dimension_numbers<[1], [0], [0], [1], [0, 0, 1, 1], [], []>} : vector<16x32xbf16>, vector<32x16xbf16>, vector<16x16xf32> -> vector<16x16xf32>
    %16 = vector.extract_strided_slice %2 {offsets = [2, 0], sizes = [1, 16], strides = [1, 1]} : vector<16x128xf32> to vector<1x16xf32>
    %17 = vector.shape_cast %16 : vector<1x16xf32> to vector<16xf32>
    %18 = vector.shape_cast %17 : vector<16xf32> to vector<1x16xf32>
    %19 = vector.broadcast %18 : vector<1x16xf32> to vector<16x16xf32>
    %20 = arith.addf %15, %19 : vector<16x16xf32>
    %c4 = arith.constant 4 : index
    %c0_13 = arith.constant 0 : index
    %c0_14 = arith.constant 0 : index
    %21 = vector.load %arg3[%c4, %c0_13, %c0_14] : memref<6x32x16xbf16, #tpu.memory_space<vmem>>, vector<1x32x16xbf16>
    %22 = vector.shape_cast %21 : vector<1x32x16xbf16> to vector<32x16xbf16>
    %cst_15 = arith.constant dense<0.000000e+00> : vector<16x16xf32>
    %23 = tpu.matmul %3, %22, %cst_15 {dimension_numbers = #tpu.dot_dimension_numbers<[1], [0], [0], [1], [0, 0, 1, 1], [], []>} : vector<16x32xbf16>, vector<32x16xbf16>, vector<16x16xf32> -> vector<16x16xf32>
    %24 = vector.extract_strided_slice %2 {offsets = [4, 0], sizes = [1, 16], strides = [1, 1]} : vector<16x128xf32> to vector<1x16xf32>
    %25 = vector.shape_cast %24 : vector<1x16xf32> to vector<16xf32>
    %26 = vector.shape_cast %25 : vector<16xf32> to vector<1x16xf32>
    %27 = vector.broadcast %26 : vector<1x16xf32> to vector<16x16xf32>
    %28 = arith.addf %23, %27 : vector<16x16xf32>
    %29 = vector.extract_strided_slice %12 {offsets = [0, 0], sizes = [8, 16], strides = [1, 1]} : vector<16x16xf32> to vector<8x16xf32>
    %30 = vector.extract_strided_slice %20 {offsets = [0, 0], sizes = [8, 16], strides = [1, 1]} : vector<16x16xf32> to vector<8x16xf32>
    %31 = vector.extract_strided_slice %28 {offsets = [0, 0], sizes = [8, 16], strides = [1, 1]} : vector<16x16xf32> to vector<8x16xf32>
    %32 = vector.extract_strided_slice %1 {offsets = [0, 0, 0], sizes = [1, 1, 8], strides = [1, 1, 1]} : vector<2x1x8xf32> to vector<1x1x8xf32>
    %33 = vector.shape_cast %32 : vector<1x1x8xf32> to vector<8xf32>
    %cst_16 = arith.constant 1.000000e+00 : f32
    %34 = vector.broadcast %cst_16 : f32 to vector<8xf32>
    %35 = arith.subf %34, %33 : vector<8xf32>
    %cst_17 = arith.constant -1.000000e+09 : f32
    %36 = vector.broadcast %cst_17 : f32 to vector<8xf32>
    %37 = arith.mulf %35, %36 : vector<8xf32>
    %38 = tpu.transpose %30, [1, 0] : vector<8x16xf32> -> vector<16x8xf32>
    %cst_18 = arith.constant dense<0.000000e+00> : vector<8x8xf32>
    %39 = tpu.matmul %29, %38, %cst_18 {dimension_numbers = #tpu.dot_dimension_numbers<[1], [0], [0], [1], [0, 0, 1, 1], [], []>} : vector<8x16xf32>, vector<16x8xf32>, vector<8x8xf32> -> vector<8x8xf32>
    %cst_19 = arith.constant 2.500000e-01 : f32
    %40 = vector.broadcast %cst_19 : f32 to vector<8x8xf32>
    %41 = arith.mulf %39, %40 : vector<8x8xf32>
    %42 = vector.shape_cast %37 : vector<8xf32> to vector<1x8xf32>
    %43 = vector.broadcast %42 : vector<1x8xf32> to vector<8x8xf32>
    %44 = arith.addf %41, %43 : vector<8x8xf32>
    %cst_20 = arith.constant dense<0xFF800000> : vector<8xf32>
    %45 = vector.multi_reduction <maximumf>, %44, %cst_20 [1] : vector<8x8xf32> to vector<8xf32>
    %46 = vector.shape_cast %45 : vector<8xf32> to vector<8x1xf32>
    %47 = vector.broadcast %46 : vector<8x1xf32> to vector<8x8xf32>
    %48 = arith.subf %44, %47 : vector<8x8xf32>
    %49 = math.exp %48 : vector<8x8xf32>
    %cst_21 = arith.constant dense<0.000000e+00> : vector<8xf32>
    %50 = vector.multi_reduction <add>, %49, %cst_21 [1] : vector<8x8xf32> to vector<8xf32>
    %51 = vector.shape_cast %50 : vector<8xf32> to vector<8x1xf32>
    %52 = tpu.reciprocal %51 {approx = true} : vector<8x1xf32> -> vector<8x1xf32>
    %53 = arith.truncf %49 : vector<8x8xf32> to vector<8x8xbf16>
    %54 = arith.truncf %31 : vector<8x16xf32> to vector<8x16xbf16>
    %cst_22 = arith.constant dense<0.000000e+00> : vector<8x16xf32>
    %55 = tpu.matmul %53, %54, %cst_22 {dimension_numbers = #tpu.dot_dimension_numbers<[1], [0], [0], [1], [0, 0, 1, 1], [], []>} : vector<8x8xbf16>, vector<8x16xbf16>, vector<8x16xf32> -> vector<8x16xf32>
    %56 = vector.broadcast %52 : vector<8x1xf32> to vector<8x16xf32>
    %57 = arith.mulf %55, %56 : vector<8x16xf32>
    %58 = vector.extract_strided_slice %12 {offsets = [8, 0], sizes = [8, 16], strides = [1, 1]} : vector<16x16xf32> to vector<8x16xf32>
    %59 = vector.extract_strided_slice %20 {offsets = [8, 0], sizes = [8, 16], strides = [1, 1]} : vector<16x16xf32> to vector<8x16xf32>
    %60 = vector.extract_strided_slice %28 {offsets = [8, 0], sizes = [8, 16], strides = [1, 1]} : vector<16x16xf32> to vector<8x16xf32>
    %61 = vector.extract_strided_slice %1 {offsets = [1, 0, 0], sizes = [1, 1, 8], strides = [1, 1, 1]} : vector<2x1x8xf32> to vector<1x1x8xf32>
    %62 = vector.shape_cast %61 : vector<1x1x8xf32> to vector<8xf32>
    %cst_23 = arith.constant 1.000000e+00 : f32
    %63 = vector.broadcast %cst_23 : f32 to vector<8xf32>
    %64 = arith.subf %63, %62 : vector<8xf32>
    %cst_24 = arith.constant -1.000000e+09 : f32
    %65 = vector.broadcast %cst_24 : f32 to vector<8xf32>
    %66 = arith.mulf %64, %65 : vector<8xf32>
    %67 = tpu.transpose %59, [1, 0] : vector<8x16xf32> -> vector<16x8xf32>
    %cst_25 = arith.constant dense<0.000000e+00> : vector<8x8xf32>
    %68 = tpu.matmul %58, %67, %cst_25 {dimension_numbers = #tpu.dot_dimension_numbers<[1], [0], [0], [1], [0, 0, 1, 1], [], []>} : vector<8x16xf32>, vector<16x8xf32>, vector<8x8xf32> -> vector<8x8xf32>
    %cst_26 = arith.constant 2.500000e-01 : f32
    %69 = vector.broadcast %cst_26 : f32 to vector<8x8xf32>
    %70 = arith.mulf %68, %69 : vector<8x8xf32>
    %71 = vector.shape_cast %66 : vector<8xf32> to vector<1x8xf32>
    %72 = vector.broadcast %71 : vector<1x8xf32> to vector<8x8xf32>
    %73 = arith.addf %70, %72 : vector<8x8xf32>
    %cst_27 = arith.constant dense<0xFF800000> : vector<8xf32>
    %74 = vector.multi_reduction <maximumf>, %73, %cst_27 [1] : vector<8x8xf32> to vector<8xf32>
    %75 = vector.shape_cast %74 : vector<8xf32> to vector<8x1xf32>
    %76 = vector.broadcast %75 : vector<8x1xf32> to vector<8x8xf32>
    %77 = arith.subf %73, %76 : vector<8x8xf32>
    %78 = math.exp %77 : vector<8x8xf32>
    %cst_28 = arith.constant dense<0.000000e+00> : vector<8xf32>
    %79 = vector.multi_reduction <add>, %78, %cst_28 [1] : vector<8x8xf32> to vector<8xf32>
    %80 = vector.shape_cast %79 : vector<8xf32> to vector<8x1xf32>
    %81 = tpu.reciprocal %80 {approx = true} : vector<8x1xf32> -> vector<8x1xf32>
    %82 = arith.truncf %78 : vector<8x8xf32> to vector<8x8xbf16>
    %83 = arith.truncf %60 : vector<8x16xf32> to vector<8x16xbf16>
    %cst_29 = arith.constant dense<0.000000e+00> : vector<8x16xf32>
    %84 = tpu.matmul %82, %83, %cst_29 {dimension_numbers = #tpu.dot_dimension_numbers<[1], [0], [0], [1], [0, 0, 1, 1], [], []>} : vector<8x8xbf16>, vector<8x16xbf16>, vector<8x16xf32> -> vector<8x16xf32>
    %85 = vector.broadcast %81 : vector<8x1xf32> to vector<8x16xf32>
    %86 = arith.mulf %84, %85 : vector<8x16xf32>
    %87 = tpu.concatenate %57, %86 in 0 : vector<8x16xf32>, vector<8x16xf32> -> vector<16x16xf32>
    %88 = arith.truncf %87 : vector<16x16xf32> to vector<16x16xbf16>
    %c0_30 = arith.constant 0 : index
    %c0_31 = arith.constant 0 : index
    %c0_32 = arith.constant 0 : index
    %89 = vector.load %arg4[%c0_30, %c0_31, %c0_32] : memref<2x16x32xbf16, #tpu.memory_space<vmem>>, vector<1x16x32xbf16>
    %90 = vector.shape_cast %89 : vector<1x16x32xbf16> to vector<16x32xbf16>
    %cst_33 = arith.constant dense<0.000000e+00> : vector<16x32xf32>
    %91 = tpu.matmul %88, %90, %cst_33 {dimension_numbers = #tpu.dot_dimension_numbers<[1], [0], [0], [1], [0, 0, 1, 1], [], []>} : vector<16x16xbf16>, vector<16x32xbf16>, vector<16x32xf32> -> vector<16x32xf32>
    %92 = arith.addf %4, %91 : vector<16x32xf32>
    %c1 = arith.constant 1 : index
    %c0_34 = arith.constant 0 : index
    %c0_35 = arith.constant 0 : index
    %93 = vector.load %arg3[%c1, %c0_34, %c0_35] : memref<6x32x16xbf16, #tpu.memory_space<vmem>>, vector<1x32x16xbf16>
    %94 = vector.shape_cast %93 : vector<1x32x16xbf16> to vector<32x16xbf16>
    %cst_36 = arith.constant dense<0.000000e+00> : vector<16x16xf32>
    %95 = tpu.matmul %3, %94, %cst_36 {dimension_numbers = #tpu.dot_dimension_numbers<[1], [0], [0], [1], [0, 0, 1, 1], [], []>} : vector<16x32xbf16>, vector<32x16xbf16>, vector<16x16xf32> -> vector<16x16xf32>
    %96 = vector.extract_strided_slice %2 {offsets = [1, 0], sizes = [1, 16], strides = [1, 1]} : vector<16x128xf32> to vector<1x16xf32>
    %97 = vector.shape_cast %96 : vector<1x16xf32> to vector<16xf32>
    %98 = vector.shape_cast %97 : vector<16xf32> to vector<1x16xf32>
    %99 = vector.broadcast %98 : vector<1x16xf32> to vector<16x16xf32>
    %100 = arith.addf %95, %99 : vector<16x16xf32>
    %c3 = arith.constant 3 : index
    %c0_37 = arith.constant 0 : index
    %c0_38 = arith.constant 0 : index
    %101 = vector.load %arg3[%c3, %c0_37, %c0_38] : memref<6x32x16xbf16, #tpu.memory_space<vmem>>, vector<1x32x16xbf16>
    %102 = vector.shape_cast %101 : vector<1x32x16xbf16> to vector<32x16xbf16>
    %cst_39 = arith.constant dense<0.000000e+00> : vector<16x16xf32>
    %103 = tpu.matmul %3, %102, %cst_39 {dimension_numbers = #tpu.dot_dimension_numbers<[1], [0], [0], [1], [0, 0, 1, 1], [], []>} : vector<16x32xbf16>, vector<32x16xbf16>, vector<16x16xf32> -> vector<16x16xf32>
    %104 = vector.extract_strided_slice %2 {offsets = [3, 0], sizes = [1, 16], strides = [1, 1]} : vector<16x128xf32> to vector<1x16xf32>
    %105 = vector.shape_cast %104 : vector<1x16xf32> to vector<16xf32>
    %106 = vector.shape_cast %105 : vector<16xf32> to vector<1x16xf32>
    %107 = vector.broadcast %106 : vector<1x16xf32> to vector<16x16xf32>
    %108 = arith.addf %103, %107 : vector<16x16xf32>
    %c5 = arith.constant 5 : index
    %c0_40 = arith.constant 0 : index
    %c0_41 = arith.constant 0 : index
    %109 = vector.load %arg3[%c5, %c0_40, %c0_41] : memref<6x32x16xbf16, #tpu.memory_space<vmem>>, vector<1x32x16xbf16>
    %110 = vector.shape_cast %109 : vector<1x32x16xbf16> to vector<32x16xbf16>
    %cst_42 = arith.constant dense<0.000000e+00> : vector<16x16xf32>
    %111 = tpu.matmul %3, %110, %cst_42 {dimension_numbers = #tpu.dot_dimension_numbers<[1], [0], [0], [1], [0, 0, 1, 1], [], []>} : vector<16x32xbf16>, vector<32x16xbf16>, vector<16x16xf32> -> vector<16x16xf32>
    %112 = vector.extract_strided_slice %2 {offsets = [5, 0], sizes = [1, 16], strides = [1, 1]} : vector<16x128xf32> to vector<1x16xf32>
    %113 = vector.shape_cast %112 : vector<1x16xf32> to vector<16xf32>
    %114 = vector.shape_cast %113 : vector<16xf32> to vector<1x16xf32>
    %115 = vector.broadcast %114 : vector<1x16xf32> to vector<16x16xf32>
    %116 = arith.addf %111, %115 : vector<16x16xf32>
    %117 = vector.extract_strided_slice %100 {offsets = [0, 0], sizes = [8, 16], strides = [1, 1]} : vector<16x16xf32> to vector<8x16xf32>
    %118 = vector.extract_strided_slice %108 {offsets = [0, 0], sizes = [8, 16], strides = [1, 1]} : vector<16x16xf32> to vector<8x16xf32>
    %119 = vector.extract_strided_slice %116 {offsets = [0, 0], sizes = [8, 16], strides = [1, 1]} : vector<16x16xf32> to vector<8x16xf32>
    %120 = vector.extract_strided_slice %1 {offsets = [0, 0, 0], sizes = [1, 1, 8], strides = [1, 1, 1]} : vector<2x1x8xf32> to vector<1x1x8xf32>
    %121 = vector.shape_cast %120 : vector<1x1x8xf32> to vector<8xf32>
    %cst_43 = arith.constant 1.000000e+00 : f32
    %122 = vector.broadcast %cst_43 : f32 to vector<8xf32>
    %123 = arith.subf %122, %121 : vector<8xf32>
    %cst_44 = arith.constant -1.000000e+09 : f32
    %124 = vector.broadcast %cst_44 : f32 to vector<8xf32>
    %125 = arith.mulf %123, %124 : vector<8xf32>
    %126 = tpu.transpose %118, [1, 0] : vector<8x16xf32> -> vector<16x8xf32>
    %cst_45 = arith.constant dense<0.000000e+00> : vector<8x8xf32>
    %127 = tpu.matmul %117, %126, %cst_45 {dimension_numbers = #tpu.dot_dimension_numbers<[1], [0], [0], [1], [0, 0, 1, 1], [], []>} : vector<8x16xf32>, vector<16x8xf32>, vector<8x8xf32> -> vector<8x8xf32>
    %cst_46 = arith.constant 2.500000e-01 : f32
    %128 = vector.broadcast %cst_46 : f32 to vector<8x8xf32>
    %129 = arith.mulf %127, %128 : vector<8x8xf32>
    %130 = vector.shape_cast %125 : vector<8xf32> to vector<1x8xf32>
    %131 = vector.broadcast %130 : vector<1x8xf32> to vector<8x8xf32>
    %132 = arith.addf %129, %131 : vector<8x8xf32>
    %cst_47 = arith.constant dense<0xFF800000> : vector<8xf32>
    %133 = vector.multi_reduction <maximumf>, %132, %cst_47 [1] : vector<8x8xf32> to vector<8xf32>
    %134 = vector.shape_cast %133 : vector<8xf32> to vector<8x1xf32>
    %135 = vector.broadcast %134 : vector<8x1xf32> to vector<8x8xf32>
    %136 = arith.subf %132, %135 : vector<8x8xf32>
    %137 = math.exp %136 : vector<8x8xf32>
    %cst_48 = arith.constant dense<0.000000e+00> : vector<8xf32>
    %138 = vector.multi_reduction <add>, %137, %cst_48 [1] : vector<8x8xf32> to vector<8xf32>
    %139 = vector.shape_cast %138 : vector<8xf32> to vector<8x1xf32>
    %140 = tpu.reciprocal %139 {approx = true} : vector<8x1xf32> -> vector<8x1xf32>
    %141 = arith.truncf %137 : vector<8x8xf32> to vector<8x8xbf16>
    %142 = arith.truncf %119 : vector<8x16xf32> to vector<8x16xbf16>
    %cst_49 = arith.constant dense<0.000000e+00> : vector<8x16xf32>
    %143 = tpu.matmul %141, %142, %cst_49 {dimension_numbers = #tpu.dot_dimension_numbers<[1], [0], [0], [1], [0, 0, 1, 1], [], []>} : vector<8x8xbf16>, vector<8x16xbf16>, vector<8x16xf32> -> vector<8x16xf32>
    %144 = vector.broadcast %140 : vector<8x1xf32> to vector<8x16xf32>
    %145 = arith.mulf %143, %144 : vector<8x16xf32>
    %146 = vector.extract_strided_slice %100 {offsets = [8, 0], sizes = [8, 16], strides = [1, 1]} : vector<16x16xf32> to vector<8x16xf32>
    %147 = vector.extract_strided_slice %108 {offsets = [8, 0], sizes = [8, 16], strides = [1, 1]} : vector<16x16xf32> to vector<8x16xf32>
    %148 = vector.extract_strided_slice %116 {offsets = [8, 0], sizes = [8, 16], strides = [1, 1]} : vector<16x16xf32> to vector<8x16xf32>
    %149 = vector.extract_strided_slice %1 {offsets = [1, 0, 0], sizes = [1, 1, 8], strides = [1, 1, 1]} : vector<2x1x8xf32> to vector<1x1x8xf32>
    %150 = vector.shape_cast %149 : vector<1x1x8xf32> to vector<8xf32>
    %cst_50 = arith.constant 1.000000e+00 : f32
    %151 = vector.broadcast %cst_50 : f32 to vector<8xf32>
    %152 = arith.subf %151, %150 : vector<8xf32>
    %cst_51 = arith.constant -1.000000e+09 : f32
    %153 = vector.broadcast %cst_51 : f32 to vector<8xf32>
    %154 = arith.mulf %152, %153 : vector<8xf32>
    %155 = tpu.transpose %147, [1, 0] : vector<8x16xf32> -> vector<16x8xf32>
    %cst_52 = arith.constant dense<0.000000e+00> : vector<8x8xf32>
    %156 = tpu.matmul %146, %155, %cst_52 {dimension_numbers = #tpu.dot_dimension_numbers<[1], [0], [0], [1], [0, 0, 1, 1], [], []>} : vector<8x16xf32>, vector<16x8xf32>, vector<8x8xf32> -> vector<8x8xf32>
    %cst_53 = arith.constant 2.500000e-01 : f32
    %157 = vector.broadcast %cst_53 : f32 to vector<8x8xf32>
    %158 = arith.mulf %156, %157 : vector<8x8xf32>
    %159 = vector.shape_cast %154 : vector<8xf32> to vector<1x8xf32>
    %160 = vector.broadcast %159 : vector<1x8xf32> to vector<8x8xf32>
    %161 = arith.addf %158, %160 : vector<8x8xf32>
    %cst_54 = arith.constant dense<0xFF800000> : vector<8xf32>
    %162 = vector.multi_reduction <maximumf>, %161, %cst_54 [1] : vector<8x8xf32> to vector<8xf32>
    %163 = vector.shape_cast %162 : vector<8xf32> to vector<8x1xf32>
    %164 = vector.broadcast %163 : vector<8x1xf32> to vector<8x8xf32>
    %165 = arith.subf %161, %164 : vector<8x8xf32>
    %166 = math.exp %165 : vector<8x8xf32>
    %cst_55 = arith.constant dense<0.000000e+00> : vector<8xf32>
    %167 = vector.multi_reduction <add>, %166, %cst_55 [1] : vector<8x8xf32> to vector<8xf32>
    %168 = vector.shape_cast %167 : vector<8xf32> to vector<8x1xf32>
    %169 = tpu.reciprocal %168 {approx = true} : vector<8x1xf32> -> vector<8x1xf32>
    %170 = arith.truncf %166 : vector<8x8xf32> to vector<8x8xbf16>
    %171 = arith.truncf %148 : vector<8x16xf32> to vector<8x16xbf16>
    %cst_56 = arith.constant dense<0.000000e+00> : vector<8x16xf32>
    %172 = tpu.matmul %170, %171, %cst_56 {dimension_numbers = #tpu.dot_dimension_numbers<[1], [0], [0], [1], [0, 0, 1, 1], [], []>} : vector<8x8xbf16>, vector<8x16xbf16>, vector<8x16xf32> -> vector<8x16xf32>
    %173 = vector.broadcast %169 : vector<8x1xf32> to vector<8x16xf32>
    %174 = arith.mulf %172, %173 : vector<8x16xf32>
    %175 = tpu.concatenate %145, %174 in 0 : vector<8x16xf32>, vector<8x16xf32> -> vector<16x16xf32>
    %176 = arith.truncf %175 : vector<16x16xf32> to vector<16x16xbf16>
    %c1_57 = arith.constant 1 : index
    %c0_58 = arith.constant 0 : index
    %c0_59 = arith.constant 0 : index
    %177 = vector.load %arg4[%c1_57, %c0_58, %c0_59] : memref<2x16x32xbf16, #tpu.memory_space<vmem>>, vector<1x16x32xbf16>
    %178 = vector.shape_cast %177 : vector<1x16x32xbf16> to vector<16x32xbf16>
    %cst_60 = arith.constant dense<0.000000e+00> : vector<16x32xf32>
    %179 = tpu.matmul %176, %178, %cst_60 {dimension_numbers = #tpu.dot_dimension_numbers<[1], [0], [0], [1], [0, 0, 1, 1], [], []>} : vector<16x16xbf16>, vector<16x32xbf16>, vector<16x32xf32> -> vector<16x32xf32>
    %180 = arith.addf %92, %179 : vector<16x32xf32>
    %181 = vector.extract_strided_slice %2 {offsets = [6, 0], sizes = [1, 32], strides = [1, 1]} : vector<16x128xf32> to vector<1x32xf32>
    %182 = vector.shape_cast %181 : vector<1x32xf32> to vector<32xf32>
    %183 = vector.shape_cast %182 : vector<32xf32> to vector<1x32xf32>
    %184 = vector.broadcast %183 : vector<1x32xf32> to vector<16x32xf32>
    %185 = arith.addf %180, %184 : vector<16x32xf32>
    %186 = arith.addf %0, %185 : vector<16x32xf32>
    %187 = vector.extract_strided_slice %2 {offsets = [7, 0], sizes = [1, 32], strides = [1, 1]} : vector<16x128xf32> to vector<1x32xf32>
    %188 = vector.shape_cast %187 : vector<1x32xf32> to vector<32xf32>
    %189 = vector.extract_strided_slice %2 {offsets = [8, 0], sizes = [1, 32], strides = [1, 1]} : vector<16x128xf32> to vector<1x32xf32>
    %190 = vector.shape_cast %189 : vector<1x32xf32> to vector<32xf32>
    %cst_61 = arith.constant dense<0.000000e+00> : vector<16xf32>
    %191 = vector.multi_reduction <add>, %186, %cst_61 [1] : vector<16x32xf32> to vector<16xf32>
    %192 = vector.shape_cast %191 : vector<16xf32> to vector<16x1xf32>
    %cst_62 = arith.constant 3.200000e+01 : f32
    %193 = vector.broadcast %cst_62 : f32 to vector<16x1xf32>
    %194 = arith.divf %192, %193 : vector<16x1xf32>
    %195 = vector.broadcast %194 : vector<16x1xf32> to vector<16x32xf32>
    %196 = arith.subf %186, %195 : vector<16x32xf32>
    %197 = arith.mulf %196, %196 : vector<16x32xf32>
    %cst_63 = arith.constant dense<0.000000e+00> : vector<16xf32>
    %198 = vector.multi_reduction <add>, %197, %cst_63 [1] : vector<16x32xf32> to vector<16xf32>
    %199 = vector.shape_cast %198 : vector<16xf32> to vector<16x1xf32>
    %cst_64 = arith.constant 3.200000e+01 : f32
    %200 = vector.broadcast %cst_64 : f32 to vector<16x1xf32>
    %201 = arith.divf %199, %200 : vector<16x1xf32>
    %202 = vector.broadcast %194 : vector<16x1xf32> to vector<16x32xf32>
    %203 = arith.subf %186, %202 : vector<16x32xf32>
    %cst_65 = arith.constant 9.99999996E-13 : f32
    %204 = vector.broadcast %cst_65 : f32 to vector<16x1xf32>
    %205 = arith.addf %201, %204 : vector<16x1xf32>
    %206 = math.rsqrt %205 : vector<16x1xf32>
    %207 = vector.broadcast %206 : vector<16x1xf32> to vector<16x32xf32>
    %208 = arith.mulf %203, %207 : vector<16x32xf32>
    %209 = vector.shape_cast %188 : vector<32xf32> to vector<1x32xf32>
    %210 = vector.broadcast %209 : vector<1x32xf32> to vector<16x32xf32>
    %211 = arith.mulf %208, %210 : vector<16x32xf32>
    %212 = vector.shape_cast %190 : vector<32xf32> to vector<1x32xf32>
    %213 = vector.broadcast %212 : vector<1x32xf32> to vector<16x32xf32>
    %214 = arith.addf %211, %213 : vector<16x32xf32>
    %215 = arith.truncf %214 : vector<16x32xf32> to vector<16x32xbf16>
    %c0_66 = arith.constant 0 : index
    %c0_67 = arith.constant 0 : index
    %216 = vector.load %arg5[%c0_66, %c0_67] : memref<32x128xbf16, #tpu.memory_space<vmem>>, vector<32x128xbf16>
    %cst_68 = arith.constant dense<0.000000e+00> : vector<16x128xf32>
    %217 = tpu.matmul %215, %216, %cst_68 {dimension_numbers = #tpu.dot_dimension_numbers<[1], [0], [0], [1], [0, 0, 1, 1], [], []>} : vector<16x32xbf16>, vector<32x128xbf16>, vector<16x128xf32> -> vector<16x128xf32>
    %218 = vector.extract_strided_slice %2 {offsets = [9, 0], sizes = [1, 128], strides = [1, 1]} : vector<16x128xf32> to vector<1x128xf32>
    %219 = vector.shape_cast %218 : vector<1x128xf32> to vector<128xf32>
    %220 = vector.shape_cast %219 : vector<128xf32> to vector<1x128xf32>
    %221 = vector.broadcast %220 : vector<1x128xf32> to vector<16x128xf32>
    %222 = arith.addf %217, %221 : vector<16x128xf32>
    %223 = arith.mulf %222, %222 : vector<16x128xf32>
    %224 = arith.mulf %222, %223 : vector<16x128xf32>
    %cst_69 = arith.constant 4.471500e-02 : f32
    %225 = vector.broadcast %cst_69 : f32 to vector<16x128xf32>
    %226 = arith.mulf %225, %224 : vector<16x128xf32>
    %227 = arith.addf %222, %226 : vector<16x128xf32>
    %cst_70 = arith.constant 0.797884583 : f32
    %228 = vector.broadcast %cst_70 : f32 to vector<16x128xf32>
    %229 = arith.mulf %228, %227 : vector<16x128xf32>
    %230 = math.tanh %229 : vector<16x128xf32>
    %cst_71 = arith.constant 1.000000e+00 : f32
    %231 = vector.broadcast %cst_71 : f32 to vector<16x128xf32>
    %232 = arith.addf %231, %230 : vector<16x128xf32>
    %cst_72 = arith.constant 5.000000e-01 : f32
    %233 = vector.broadcast %cst_72 : f32 to vector<16x128xf32>
    %234 = arith.mulf %233, %232 : vector<16x128xf32>
    %235 = arith.mulf %222, %234 : vector<16x128xf32>
    %236 = arith.truncf %235 : vector<16x128xf32> to vector<16x128xbf16>
    %c0_73 = arith.constant 0 : index
    %c0_74 = arith.constant 0 : index
    %237 = vector.load %arg6[%c0_73, %c0_74] : memref<128x32xbf16, #tpu.memory_space<vmem>>, vector<128x32xbf16>
    %cst_75 = arith.constant dense<0.000000e+00> : vector<16x32xf32>
    %238 = tpu.matmul %236, %237, %cst_75 {dimension_numbers = #tpu.dot_dimension_numbers<[1], [0], [0], [1], [0, 0, 1, 1], [], []>} : vector<16x128xbf16>, vector<128x32xbf16>, vector<16x32xf32> -> vector<16x32xf32>
    %239 = vector.extract_strided_slice %2 {offsets = [10, 0], sizes = [1, 32], strides = [1, 1]} : vector<16x128xf32> to vector<1x32xf32>
    %240 = vector.shape_cast %239 : vector<1x32xf32> to vector<32xf32>
    %241 = vector.shape_cast %240 : vector<32xf32> to vector<1x32xf32>
    %242 = vector.broadcast %241 : vector<1x32xf32> to vector<16x32xf32>
    %243 = arith.addf %238, %242 : vector<16x32xf32>
    %244 = arith.addf %214, %243 : vector<16x32xf32>
    %245 = vector.extract_strided_slice %2 {offsets = [11, 0], sizes = [1, 32], strides = [1, 1]} : vector<16x128xf32> to vector<1x32xf32>
    %246 = vector.shape_cast %245 : vector<1x32xf32> to vector<32xf32>
    %247 = vector.extract_strided_slice %2 {offsets = [12, 0], sizes = [1, 32], strides = [1, 1]} : vector<16x128xf32> to vector<1x32xf32>
    %248 = vector.shape_cast %247 : vector<1x32xf32> to vector<32xf32>
    %cst_76 = arith.constant dense<0.000000e+00> : vector<16xf32>
    %249 = vector.multi_reduction <add>, %244, %cst_76 [1] : vector<16x32xf32> to vector<16xf32>
    %250 = vector.shape_cast %249 : vector<16xf32> to vector<16x1xf32>
    %cst_77 = arith.constant 3.200000e+01 : f32
    %251 = vector.broadcast %cst_77 : f32 to vector<16x1xf32>
    %252 = arith.divf %250, %251 : vector<16x1xf32>
    %253 = vector.broadcast %252 : vector<16x1xf32> to vector<16x32xf32>
    %254 = arith.subf %244, %253 : vector<16x32xf32>
    %255 = arith.mulf %254, %254 : vector<16x32xf32>
    %cst_78 = arith.constant dense<0.000000e+00> : vector<16xf32>
    %256 = vector.multi_reduction <add>, %255, %cst_78 [1] : vector<16x32xf32> to vector<16xf32>
    %257 = vector.shape_cast %256 : vector<16xf32> to vector<16x1xf32>
    %cst_79 = arith.constant 3.200000e+01 : f32
    %258 = vector.broadcast %cst_79 : f32 to vector<16x1xf32>
    %259 = arith.divf %257, %258 : vector<16x1xf32>
    %260 = vector.broadcast %252 : vector<16x1xf32> to vector<16x32xf32>
    %261 = arith.subf %244, %260 : vector<16x32xf32>
    %cst_80 = arith.constant 9.99999996E-13 : f32
    %262 = vector.broadcast %cst_80 : f32 to vector<16x1xf32>
    %263 = arith.addf %259, %262 : vector<16x1xf32>
    %264 = math.rsqrt %263 : vector<16x1xf32>
    %265 = vector.broadcast %264 : vector<16x1xf32> to vector<16x32xf32>
    %266 = arith.mulf %261, %265 : vector<16x32xf32>
    %267 = vector.shape_cast %246 : vector<32xf32> to vector<1x32xf32>
    %268 = vector.broadcast %267 : vector<1x32xf32> to vector<16x32xf32>
    %269 = arith.mulf %266, %268 : vector<16x32xf32>
    %270 = vector.shape_cast %248 : vector<32xf32> to vector<1x32xf32>
    %271 = vector.broadcast %270 : vector<1x32xf32> to vector<16x32xf32>
    %272 = arith.addf %269, %271 : vector<16x32xf32>
    %273 = vector.extract_strided_slice %272 {offsets = [0, 0], sizes = [1, 32], strides = [1, 1]} : vector<16x32xf32> to vector<1x32xf32>
    %274 = vector.extract_strided_slice %272 {offsets = [8, 0], sizes = [1, 32], strides = [1, 1]} : vector<16x32xf32> to vector<1x32xf32>
    %275 = tpu.concatenate %273, %274 in 0 : vector<1x32xf32>, vector<1x32xf32> -> vector<2x32xf32>
    %276 = arith.truncf %275 : vector<2x32xf32> to vector<2x32xbf16>
    %c0_81 = arith.constant 0 : index
    %c0_82 = arith.constant 0 : index
    %277 = vector.load %arg7[%c0_81, %c0_82] : memref<32x128xbf16, #tpu.memory_space<vmem>>, vector<32x128xbf16>
    %cst_83 = arith.constant dense<0.000000e+00> : vector<2x128xf32>
    %278 = tpu.matmul %276, %277, %cst_83 {dimension_numbers = #tpu.dot_dimension_numbers<[1], [0], [0], [1], [0, 0, 1, 1], [], []>} : vector<2x32xbf16>, vector<32x128xbf16>, vector<2x128xf32> -> vector<2x128xf32>
    %279 = vector.extract_strided_slice %2 {offsets = [13, 0], sizes = [1, 128], strides = [1, 1]} : vector<16x128xf32> to vector<1x128xf32>
    %280 = vector.shape_cast %279 : vector<1x128xf32> to vector<128xf32>
    %281 = vector.shape_cast %280 : vector<128xf32> to vector<1x128xf32>
    %282 = vector.broadcast %281 : vector<1x128xf32> to vector<2x128xf32>
    %283 = arith.addf %278, %282 : vector<2x128xf32>
    %284 = vector.shape_cast %283 : vector<2x128xf32> to vector<2x1x128xf32>
    %c0_84 = arith.constant 0 : index
    %c0_85 = arith.constant 0 : index
    %c0_86 = arith.constant 0 : index
    %285 = vector.load %arg9[%c0_84, %c0_85, %c0_86] : memref<2x1x128xf32, #tpu.memory_space<vmem>>, vector<2x1x128xf32>
    tpu.vector_store %arg9[%c0_84, %c0_85, %c0_86], %284 {strides = array<i32>} : memref<2x1x128xf32, #tpu.memory_space<vmem>>, vector<2x1x128xf32>,
    return
  }
  func.func @transform_0(%arg0: i32) -> (i32, i32) {
    %c0_i32 = arith.constant 0 : i32
    %c0_i32_0 = arith.constant 0 : i32
    return %arg0, %c0_i32 : i32, i32
  }
  func.func @transform_1(%arg0: i32) -> (i32, i32, i32) {
    %c0_i32 = arith.constant 0 : i32
    %c0_i32_0 = arith.constant 0 : i32
    %c0_i32_1 = arith.constant 0 : i32
    return %arg0, %c0_i32, %c0_i32_0 : i32, i32, i32
  }
  func.func @transform_2(%arg0: i32) -> (i32, i32, i32) {
    %c0_i32 = arith.constant 0 : i32
    %c0_i32_0 = arith.constant 0 : i32
    %c0_i32_1 = arith.constant 0 : i32
    %c0_i32_2 = arith.constant 0 : i32
    return %c0_i32, %c0_i32_0, %c0_i32_1 : i32, i32, i32
  }
  func.func @transform_3(%arg0: i32) -> (i32, i32, i32) {
    %c0_i32 = arith.constant 0 : i32
    %c0_i32_0 = arith.constant 0 : i32
    %c0_i32_1 = arith.constant 0 : i32
    %c0_i32_2 = arith.constant 0 : i32
    return %c0_i32, %c0_i32_0, %c0_i32_1 : i32, i32, i32
  }
  func.func @transform_4(%arg0: i32) -> (i32, i32) {
    %c0_i32 = arith.constant 0 : i32
    %c0_i32_0 = arith.constant 0 : i32
    %c0_i32_1 = arith.constant 0 : i32
    return %c0_i32, %c0_i32_0 : i32, i32
  }
  func.func @transform_5(%arg0: i32) -> (i32, i32) {
    %c0_i32 = arith.constant 0 : i32
    %c0_i32_0 = arith.constant 0 : i32
    %c0_i32_1 = arith.constant 0 : i32
    return %c0_i32, %c0_i32_0 : i32, i32
  }
  func.func @transform_6(%arg0: i32) -> (i32, i32) {
    %c0_i32 = arith.constant 0 : i32
    %c0_i32_0 = arith.constant 0 : i32
    %c0_i32_1 = arith.constant 0 : i32
    return %c0_i32, %c0_i32_0 : i32, i32
  }
  func.func @transform_7(%arg0: i32) -> (i32, i32) {
    %c0_i32 = arith.constant 0 : i32
    %c0_i32_0 = arith.constant 0 : i32
    %c0_i32_1 = arith.constant 0 : i32
    return %c0_i32, %c0_i32_0 : i32, i32
  }
  func.func @transform_8(%arg0: i32) -> (i32, i32, i32) {
    %c0_i32 = arith.constant 0 : i32
    %c0_i32_0 = arith.constant 0 : i32
    %c0_i32_1 = arith.constant 0 : i32
    return %arg0, %c0_i32, %c0_i32_0 : i32, i32, i32
  }
}

</mosaic_0001>

<bundles_post_ra>
// kernel: text_classifier_forward.1
= control target key start
LH: loop header
LB: loop body
LE: loop exit
PB: predicated region body
PF: predicated region fallthrough
CT: control target
= control target key end

     0   :  { %v1828_v1 = vmov 0.0   ;;  %vm1829_vm0 = vmmov 0   ;;  %vm58_vm1 = vcmask 261120   ;;  %s2199_s0 = inlined_call_operand.vmem [shape: f32[16,32], index: 0, kind: input, shape index: {}]   ;;  %s2200_s1 = inlined_call_operand.vmem [shape: f32[2,1,8], index: 1, kind: input, shape index: {}]   ;;  %s2201_s2 = inlined_call_operand.vmem [shape: bf16[6,32,16], index: 2, kind: input, shape index: {}]   ;;  %s2202_s3 = inlined_call_operand.vmem [shape: bf16[2,16,32], index: 3, kind: input, shape index: {}]   ;;  %s2203_s4 = inlined_call_operand.vmem [shape: bf16[32,128], index: 4, kind: input, shape index: {}]   ;;  %s2204_s5 = inlined_call_operand.vmem [shape: bf16[128,32], index: 5, kind: input, shape index: {}]   ;;  %s2205_s6 = inlined_call_operand.vmem [shape: bf16[32,128], index: 6, kind: input, shape index: {}]   ;;  %s2206_s7 = inlined_call_operand.vmem [shape: f32[16,128], index: 7, kind: input, shape index: {}]   ;;  %s2207_s8 = inlined_call_operand.hbm [shape: f32[2,1,128], index: 8, kind: output, shape index: {}]  }
   0x1   :  { %v1750_v0 = vld [vmem:[%s2201_s2] sm:$0xff]   ;;  %1604 = vmatprep.subr.bf16.mxu1 %v1828_v1  ;;  %v1751_v2 = vld [vmem:[%s2201_s2 + $0x8] sm:$0xff]   ;;  %1620 = vmatprep.subr.bf16.mxu0 %v1828_v1 }
   0x2   :  { %1605 = vmatpush3.bf16.msra.mxu1 %v1750_v0  ;;  %1608 = vmatprep.mubr.msk.bf16.mxu1 %vm1829_vm0, %v1828_v1  ;;  %v1892_v3 = vld [vmem:[%s2199_s0] sm:$0xff]  ;;  %v1897_v4 = vld [vmem:[%s2199_s0 + $0x8] sm:$0xff] }
   0x3   :  { %1606 = vmatprep.subr.bf16.mxu1 %v1828_v1  ;;  %1624 = vmatprep.mubr.msk.bf16.mxu0 %vm1829_vm0, %v1828_v1  ;;  %v1904_v5 = vpack.c.bf16 %v1897_v4, %v1892_v3  ;;  %v1752_v6 = vld [vmem:[%s2201_s2 + $0x20] sm:$0xff]   ;;  %v1753_v8 = vld [vmem:[%s2201_s2 + $0x28] sm:$0xff]  }
   0x4   :  { %v1754_v7 = vld [vmem:[%s2201_s2 + $0x40] sm:$0xff]  }
   0x5   :  { %1621 = vmatpush3.bf16.msra.mxu0 %v1754_v7 }
   0x6   :  { %1607 = vmatpush3.bf16.msra.mxu1 %v1751_v2  ;;  %1622 = vmatprep.subr.bf16.mxu0 %v1828_v1 }
   0x7   :  { %1612 = vmatprep.subr.bf16.mxu1 %v1828_v1 }
   0x9   :  { %1609 = vmatmul.mubr.msk.bf16.vlgmr.msra.gmra.mrb[0].mxu1 %vm58_vm1, %v1904_v5 }
   0xa   :  { %1613 = vmatpush3.bf16.msra.mxu1 %v1752_v6  ;;  %1616 = vmatprep.mubr.msk.bf16.mxu1 %vm1829_vm0, %v1828_v1 }
   0xb   :  { %1614 = vmatprep.subr.bf16.mxu1 %v1828_v1 }
   0xe   :  { %1615 = vmatpush3.bf16.msra.mxu1 %v1753_v8 }
   0xf   :  { %1628 = vmatprep.subr.mxu1 %v1828_v1 }
  0x11   :  { %1617 = vmatmul.mubr.msk.bf16.vlgmr.msra.gmra.mrb[4].mxu1 %vm58_vm1, %v1904_v5 }
  0x12   :  { %1630 = vmatprep.mubr.msk.f32.mxu1 %vm1829_vm0, %v1828_v1 }
  0x13   :  { %13 = vsyncpa [#allocation3], 0  ;;  %v1755_v9 = vld [vmem:[%s2201_s2 + $0x48] sm:$0xff]   ;;  %v42_v10 = vlaneseq  ;;  %v1941_v17 = vld [vmem:[%s2206_s7] sm:$0xff]  ;;  %vm229_vm2 = vcmask 130048   ;;  %vm330_vm3 = vcmask 1043456  }
  0x14   :  { %1623 = vmatpush3.bf16.msra.mxu0 %v1755_v9  ;;  %v34_v41 = vld [vmem:[%s2200_s1 + $0x1] sm:$0x1]  ;;  %v33_v42 = vld [vmem:[%s2200_s1] sm:$0x1]  ;;  %vm314_vm4 = vcmask 64512   ;;  %v1756_v6 = vld [vmem:[%s2201_s2 + $0x30] sm:$0xff]  }
  0x15   :  { %1639 = vmatprep.subr.mxu0 %v1828_v1  ;;  %v1935_v11 = vshrl.u32 %v42_v10, 7  ;;  %v375_v43 = vsub.f32 1.0, %v34_v41  ;;  %v227_v44 = vsub.f32 1.0, %v33_v42  ;;  %v1757_v9 = vld [vmem:[%s2201_s2 + $0x10] sm:$0xff]   ;;  %v1758_v10 = vld [vmem:[%s2201_s2 + $0x38] sm:$0xff]   ;;  %vm1370_vm5 = vcmask 1040384  }
  0x17   :  { %1625 = vmatmul.mubr.msk.bf16.vlgmr.msra.gmra.mrb[0].mxu0 %vm58_vm1, %v1904_v5  ;;  %v110_v14 = vsub.s32 2, %v1935_v11  ;;  %v1944_v18 = vsub.s32 0, %v1935_v11  ;;  %v172_v29 = vsub.s32 4, %v1935_v11  ;;  %v376_v45 = vmul.f32 -1e+09, %v375_v43 }
  0x18   :  { %1641 = vmatprep.mubr.msk.f32.mxu0 %vm1829_vm0, %v1828_v1  ;;  %v228_v46 = vmul.f32 -1e+09, %v227_v44  ;;  %v654_v44 = vsub.s32 5, %v1935_v11 }
  0x19   :  { %v111_v19 = vrot.slane %v1941_v17, %v110_v14  ;;  %v45_v20 = vrot.slane %v1941_v17, %v1944_v18  ;;  %v173_v30 = vrot.slane %v1941_v17, %v172_v29  ;;  %v1976_v49 = vrot.slane %v376_v45, %v1944_v18 }
  0x1a   :  { %v1979_v54 = vrot.slane %v228_v46, %v1944_v18  ;;  %v655_v45 = vrot.slane %v1941_v17, %v654_v44 }
  0xdc   :  { %v96_v12 = vpop.f32.mrb[0].mxu1 }
  0xdd   :  { %v1610_v13 = vpop.f32.mrb[1].mxu1  ;;  %v97_v27 = vadd.f32 %v96_v12, %v45_v20 }
  0xde   :  { %v99_v15 = vpop.f32.mrb[2].mxu1 }
  0xdf   :  { %v1611_v16 = vpop.f32.mrb[3].mxu1  ;;  %v100_v28 = vadd.f32 %v99_v15, %v45_v20  ;;  %v1759_v15 = vld [vmem:[%s2201_s2 + $0x18] sm:$0xff]  }
  0xe0   :  { %v1760_v16 = vld [vmem:[%s2201_s2 + $0x50] sm:$0xff]  }
  0xe4   :  { %v158_v21 = vpop.f32.mrb[4].mxu1 }
  0xe5   :  { %v159_v22 = vadd.f32 %v158_v21, %v111_v19  ;;  %v1618_v23 = vpop.f32.mrb[5].mxu1 }
  0xe6   :  { %v161_v24 = vpop.f32.mrb[6].mxu1 }
  0xe7   :  { %v162_v25 = vadd.f32 %v161_v24, %v111_v19  ;;  %v1619_v26 = vpop.f32.mrb[7].mxu1  ;;  %1629 = vmatpush3.xpose.msk.msra.mxu1 %vm229_vm2, %v159_v22  ;;  %v1761_v19 = vld [vmem:[%s2201_s2 + $0x58] sm:$0xff]   ;;  %v592_v22 = vsub.s32 3, %v1935_v11 }
  0xe8   :  { %1633 = vmatprep.subr.bf16.mxu1 %v1828_v1 }
  0xe9   :  { %1640 = vmatpush3.xpose.msk.msra.mxu0 %vm229_vm2, %v162_v25 }
  0xea   :  { %1631 = vmatmul.mubr.msk.f32.vlgmr.msra.gmra.mrb[8].mxu1 %vm229_vm2, %v97_v27  ;;  %1644 = vmatprep.subr.bf16.mxu0 %v1828_v1  ;;  %v220_v31 = vpop.f32.mrb[0].mxu0  ;;  %v593_v27 = vrot.slane %v1941_v17, %v592_v22 }
  0xeb   :  { %1635 = vmatprep.mubr.msk.bf16.mxu1 %vm1829_vm0, %v1828_v1  ;;  %v221_v32 = vadd.f32 %v220_v31, %v173_v30  ;;  %v1626_v33 = vpop.f32.mrb[1].mxu0 }
  0xec   :  { %1642 = vmatmul.mubr.msk.f32.vlgmr.msra.gmra.mrb[4].mxu0 %vm229_vm2, %v100_v28  ;;  %v223_v34 = vpop.f32.mrb[2].mxu0  ;;  %v530_v28 = vsub.s32 1, %v1935_v11 }
  0xed   :  { %1646 = vmatprep.mubr.msk.bf16.mxu0 %vm1829_vm0, %v1828_v1  ;;  %v326_v35 = vpack.c.bf16 %v221_v32, %v221_v32  ;;  %v224_v36 = vadd.f32 %v223_v34, %v173_v30  ;;  %v1627_v37 = vpop.f32.mrb[3].mxu0 }
  0xee   :  { %v531_v34 = vrot.slane %v1941_v17, %v530_v28 }
  0xef   :  { %v332_v38 = vsel %vm330_vm3, %v326_v35, 0  ;;  %v472_v39 = vpack.c.bf16 %v224_v36, %v224_v36 }
  0xf0   :  { %1634 = vmatpush3.bf16.msra.mxu1 %v332_v38 }
  0xf1   :  { %v477_v40 = vsel %vm330_vm3, %v472_v39, 0  ;;  %1650 = vmatprep.subr.bf16.mxu1 %v1828_v1 }
  0xf2   :  { %1645 = vmatpush3.bf16.msra.mxu0 %v477_v40 }
  0xf3   :  { %1658 = vmatprep.subr.bf16.mxu0 %v1828_v1 }
 0x1bd   :  { %v302_v47 = vpop.f32.mrb[8].mxu1 }
 0x1be   :  { %v1632_v48 = vpop.f32.mrb[9].mxu1  ;;  %v306_v51 = vmul.f32 0.25, %v302_v47 }
 0x1bf   :  { %v449_v50 = vpop.f32.mrb[4].mxu0 }
 0x1c0   :  { %v453_v52 = vmul.f32 0.25, %v449_v50  ;;  %v1643_v53 = vpop.f32.mrb[5].mxu0  ;;  %v313_v57 = vadd.f32 %v1979_v54, %v306_v51 }
 0x1c2   :  { %v460_v55 = vadd.f32 %v1976_v49, %v453_v52  ;;  %v315_v58 = vsel %vm314_vm4, %v313_v57, -inf }
 0x1c4   :  { %v461_v56 = vsel %vm314_vm4, %v460_v55, -inf }
 0x1c5   :  { %462 = vmax.xlane.f32.xlu0 %v461_v56 }
 0x1c9   :  { %316 = vmax.xlane.f32.xlu0 %v315_v58 }
 0x252   :  { %v463_v59 = vpop.xlane.xlu0 %462 }
 0x253   :  { %v464_v60 = vsub.f32 %v460_v55, %v463_v59 }
 0x255   :  { %v465_v61 = vmul.f32 1.442695, %v464_v60 }
 0x256   :  { %v317_v62 = vpop.xlane.xlu0 %316 }
 0x257   :  { %1776 = vpow2.f32 %v465_v61  ;;  %v318_v63 = vsub.f32 %v313_v57, %v317_v62 }
 0x259   :  { %v319_v0 = vmul.f32 1.442695, %v318_v63 }
 0x25b   :  { %1778 = vpow2.f32 %v319_v0 }
 0x261   :  { %v1985_v2 = vpop.eup %1776 }
 0x262   :  { %v471_v7 = vpack.c.bf16 %v1985_v2, %v1985_v2 }
 0x264   :  { %1647 = vmatmul.mubr.msk.bf16.vlgmr.msra.gmra.mrb[8].mxu0 %vm314_vm4, %v471_v7 }
 0x265   :  { %v1779_v8 = vpop.eup %1778  ;;  %1659 = vmatpush3.bf16.msra.mxu0 %v1756_v6  ;;  %1662 = vmatprep.mubr.msk.bf16.mxu0 %vm1829_vm0, %v1828_v1 }
 0x266   :  { %v321_v12 = vsel %vm314_vm4, %v1779_v8, 0.0  ;;  %v325_v13 = vpack.c.bf16 %v1779_v8, %v1779_v8  ;;  %1660 = vmatprep.subr.bf16.mxu0 %v1828_v1 }
 0x267   :  { %322 = vadd.xlane.f32.xlu0 %v321_v12 }
 0x268   :  { %1636 = vmatmul.mubr.msk.bf16.vlgmr.msra.gmra.mrb[12].mxu1 %vm314_vm4, %v325_v13 }
 0x269   :  { %1651 = vmatpush3.bf16.msra.mxu1 %v1757_v9  ;;  %1661 = vmatpush3.bf16.msra.mxu0 %v1758_v10  ;;  %v467_v9 = vsel %vm314_vm4, %v1985_v2, 0.0 }
 0x26a   :  { %1652 = vmatprep.subr.bf16.mxu1 %v1828_v1  ;;  %1654 = vmatprep.mubr.msk.bf16.mxu1 %vm1829_vm0, %v1828_v1 }
 0x26b   :  { %1685 = vmatprep.subr.mxu0 %v1828_v1 }
 0x26c   :  { %1663 = vmatmul.mubr.msk.bf16.vlgmr.msra.gmra.mrb[12].mxu0 %vm58_vm1, %v1904_v5 }
 0x26d   :  { %1653 = vmatpush3.bf16.msra.mxu1 %v1759_v15  ;;  %1687 = vmatprep.mubr.msk.f32.mxu0 %vm1829_vm0, %v1828_v1 }
 0x26e   :  { %1666 = vmatprep.subr.bf16.mxu1 %v1828_v1 }
 0x270   :  { %1655 = vmatmul.mubr.msk.bf16.vlgmr.msra.gmra.mrb[16].mxu1 %vm58_vm1, %v1904_v5 }
 0x271   :  { %1670 = vmatprep.mubr.msk.bf16.mxu1 %vm1829_vm0, %v1828_v1  ;;  %1667 = vmatpush3.bf16.msra.mxu1 %v1760_v16 }
 0x272   :  { %1668 = vmatprep.subr.bf16.mxu1 %v1828_v1 }
 0x275   :  { %1669 = vmatpush3.bf16.msra.mxu1 %v1761_v19 }
 0x276   :  { %1674 = vmatprep.subr.mxu1 %v1828_v1 }
 0x278   :  { %1671 = vmatmul.mubr.msk.bf16.vlgmr.msra.gmra.mrb[20].mxu1 %vm58_vm1, %v1904_v5 }
 0x279   :  { %1676 = vmatprep.mubr.msk.f32.mxu1 %vm1829_vm0, %v1828_v1 }
 0x2f4   :  { %v323_v16 = vpop.xlane.xlu0 %322 }
 0x337   :  { %v2032_v20 = vpop.f32.mrb[8].mxu0 }
 0x338   :  { %v1648_v21 = vpop.f32.mrb[9].mxu0 }
 0x339   :  { %v516_v23 = vpop.f32.mrb[10].mxu0 }
 0x33a   :  { %v1649_v24 = vpop.f32.mrb[11].mxu0 }
 0x33b   :  { %v2035_v25 = vpop.f32.mrb[12].mxu1 }
 0x33c   :  { %v1637_v26 = vpop.f32.mrb[13].mxu1 }
 0x33d   :  { %v371_v5 = vpop.f32.mrb[14].mxu1 }
 0x33e   :  { %v1638_v30 = vpop.f32.mrb[15].mxu1 }
 0x33f   :  { %v640_v31 = vpop.f32.mrb[12].mxu0 }
 0x340   :  { %v641_v32 = vadd.f32 %v640_v31, %v593_v27  ;;  %v1664_v33 = vpop.f32.mrb[13].mxu0 }
 0x341   :  { %v643_v35 = vpop.f32.mrb[14].mxu0 }
 0x342   :  { %v644_v36 = vadd.f32 %v643_v35, %v593_v27  ;;  %v1665_v37 = vpop.f32.mrb[15].mxu0  ;;  %1675 = vmatpush3.xpose.msk.msra.mxu1 %vm229_vm2, %v641_v32  ;;  %v1762_v27 = vld [vmem:[%s2202_s3] sm:$0xff]  }
 0x343   :  { %v578_v38 = vpop.f32.mrb[16].mxu1  ;;  %1679 = vmatprep.subr.bf16.mxu1 %v1828_v1 }
 0x344   :  { %v579_v39 = vadd.f32 %v578_v38, %v531_v34  ;;  %1686 = vmatpush3.xpose.msk.msra.mxu0 %vm229_vm2, %v644_v36  ;;  %v1656_v40 = vpop.f32.mrb[17].mxu1 }
 0x345   :  { %v581_v41 = vpop.f32.mrb[18].mxu1  ;;  %1690 = vmatprep.subr.bf16.mxu0 %v1828_v1 }
 0x346   :  { %1677 = vmatmul.mubr.msk.f32.vlgmr.msra.gmra.mrb[10].mxu1 %vm229_vm2, %v579_v39  ;;  %v582_v42 = vadd.f32 %v581_v41, %v531_v34  ;;  %v1657_v43 = vpop.f32.mrb[19].mxu1 }
 0x347   :  { %1681 = vmatprep.mubr.msk.bf16.mxu1 %vm1829_vm0, %v1828_v1 }
 0x348   :  { %1688 = vmatmul.mubr.msk.f32.vlgmr.msra.gmra.mrb[6].mxu0 %vm229_vm2, %v582_v42 }
 0x349   :  { %1692 = vmatprep.mubr.msk.bf16.mxu0 %vm1829_vm0, %v1828_v1 }
 0x34b   :  { %v702_v46 = vpop.f32.mrb[20].mxu1 }
 0x34c   :  { %v703_v47 = vadd.f32 %v702_v46, %v655_v45  ;;  %v1672_v48 = vpop.f32.mrb[21].mxu1 }
 0x34d   :  { %v705_v50 = vpop.f32.mrb[22].mxu1 }
 0x34e   :  { %v798_v51 = vpack.c.bf16 %v703_v47, %v703_v47  ;;  %v706_v52 = vadd.f32 %v705_v50, %v655_v45  ;;  %v1673_v53 = vpop.f32.mrb[23].mxu1 }
 0x350   :  { %v803_v55 = vsel %vm330_vm3, %v798_v51, 0  ;;  %v935_v56 = vpack.c.bf16 %v706_v52, %v706_v52 }
 0x351   :  { %1680 = vmatpush3.bf16.msra.mxu1 %v803_v55 }
 0x352   :  { %v940_v57 = vsel %vm330_vm3, %v935_v56, 0  ;;  %1696 = vmatprep.subr.bf16.mxu1 %v1828_v1  ;;  %v1089_v56 = vsub.s32 6, %v1935_v11 }
 0x353   :  { %1691 = vmatpush3.bf16.msra.mxu0 %v940_v57 }
 0x354   :  { %1702 = vmatprep.subr.bf16.mxu0 %v1828_v1  ;;  %v1090_v57 = vrot.slane %v1941_v17, %v1089_v56 }
 0x419   :  { %v781_v58 = vpop.f32.mrb[10].mxu1 }
 0x41a   :  { %v785_v59 = vmul.f32 0.25, %v781_v58  ;;  %v1678_v60 = vpop.f32.mrb[11].mxu1 }
 0x41b   :  { %v918_v61 = vpop.f32.mrb[6].mxu0 }
 0x41c   :  { %v922_v62 = vmul.f32 0.25, %v918_v61  ;;  %v1689_v63 = vpop.f32.mrb[7].mxu0  ;;  %v786_v0 = vadd.f32 %v785_v59, %v1979_v54 }
 0x41e   :  { %v787_v6 = vsel %vm314_vm4, %v786_v0, -inf  ;;  %v923_v7 = vadd.f32 %v922_v62, %v1976_v49 }
 0x41f   :  { %788 = vmax.xlane.f32.xlu1 %v787_v6 }
 0x420   :  { %v924_v8 = vsel %vm314_vm4, %v923_v7, -inf }
 0x423   :  { %925 = vmax.xlane.f32.xlu1 %v924_v8 }
 0x427   :  { %468 = vadd.xlane.f32.xlu1 %v467_v9 }
 0x4ac   :  { %v789_v10 = vpop.xlane.xlu1 %788 }
 0x4ad   :  { %v790_v12 = vsub.f32 %v786_v0, %v789_v10 }
 0x4af   :  { %v791_v13 = vmul.f32 1.442695, %v790_v12 }
 0x4b0   :  { %v926_v15 = vpop.xlane.xlu1 %925 }
 0x4b1   :  { %1780 = vpow2.f32 %v791_v13  ;;  %v927_v19 = vsub.f32 %v923_v7, %v926_v15 }
 0x4b2   :  { %1782 = vrcp.f32 %v323_v16 }
 0x4b3   :  { %v928_v54 = vmul.f32 1.442695, %v927_v19 }
 0x4b4   :  { %v469_v21 = vpop.xlane.xlu1 %468 }
 0x4b5   :  { %1784 = vpow2.f32 %v928_v54 }
 0x4b6   :  { %1786 = vrcp.f32 %v469_v21 }
 0x4bb   :  { %v1781_v49 = vpop.eup %1780 }
 0x4bc   :  { %v793_v23 = vsel %vm314_vm4, %v1781_v49, 0.0  ;;  %v797_v24 = vpack.c.bf16 %v1781_v49, %v1781_v49  ;;  %v1783_v26 = vpop.eup %1782 }
 0x4bd   :  { %794 = vadd.xlane.f32.xlu0 %v793_v23  ;;  %v374_v32 = vmul.f32 %v1783_v26, %v2035_v25  ;;  %v1763_v25 = vld [vmem:[%s2202_s3 + $0x8] sm:$0xff]  }
 0x4be   :  { %1682 = vmatmul.mubr.msk.bf16.vlgmr.msra.gmra.mrb[24].mxu1 %vm314_vm4, %v797_v24  ;;  %v1765_v24 = vld [vmem:[%s2203_s4 + $0x8] sm:$0xff]  }
 0x4bf   :  { %v1785_v2 = vpop.eup %1784  ;;  %1698 = vmatprep.mubr.msk.bf16.mxu1 %vm1829_vm0, %v1828_v1  ;;  %1697 = vmatpush3.bf16.msra.mxu1 %v1763_v25  ;;  %v2113_v25 = vld [vmem:[%s2206_s7 + $0x8] sm:$0xff] }
 0x4c0   :  { %v1787_v5 = vpop.eup %1786  ;;  %v930_v30 = vsel %vm314_vm4, %v1785_v2, 0.0  ;;  %v934_v31 = vpack.c.bf16 %v1785_v2, %v1785_v2  ;;  %1708 = vmatprep.subr.bf16.mxu1 %v1828_v1 }
 0x4c1   :  { %v519_v33 = vmul.f32 %v1787_v5, %v2032_v20  ;;  %931 = vadd.xlane.f32.xlu1 %v930_v30 }
 0x4c2   :  { %1693 = vmatmul.mubr.msk.bf16.vlgmr.msra.gmra.mrb[16].mxu0 %vm314_vm4, %v934_v31 }
 0x4c3   :  { %1703 = vmatpush3.bf16.msra.mxu0 %v1762_v27  ;;  %1704 = vmatprep.mubr.msk.bf16.mxu0 %vm1829_vm0, %v1828_v1  ;;  %v520_v34 = vpack.c.bf16 %v519_v33, %v374_v32  ;;  %v1124_v32 = vsub.s32 7, %v1935_v11 }
 0x4c4   :  { %1716 = vmatprep.subr.bf16.mxu0 %v1828_v1 }
 0x4c5   :  { %v1125_v33 = vrot.slane %v1941_v17, %v1124_v32 }
 0x4ca   :  { %1705 = vmatmul.mubr.msk.bf16.vlgmr.msra.gmra.mrb[20].mxu0 %vm229_vm2, %v520_v34 }
 0x4cb   :  { %1732 = vmatprep.mubr.msk.bf16.mxu0 %vm1829_vm0, %v1828_v1 }
 0x54a   :  { %v795_v20 = vpop.xlane.xlu0 %794 }
 0x54b   :  { %1788 = vrcp.f32 %v795_v20 }
 0x54e   :  { %v932_v35 = vpop.xlane.xlu1 %931 }
 0x54f   :  { %1790 = vrcp.f32 %v932_v35 }
 0x555   :  { %v1789_v39 = vpop.eup %1788 }
 0x559   :  { %v1791_v41 = vpop.eup %1790 }
 0x591   :  { %v839_v36 = vpop.f32.mrb[24].mxu1 }
 0x592   :  { %v1683_v37 = vpop.f32.mrb[25].mxu1  ;;  %v845_v43 = vmul.f32 %v1789_v39, %v839_v36 }
 0x593   :  { %v842_v38 = vpop.f32.mrb[26].mxu1 }
 0x594   :  { %v1684_v40 = vpop.f32.mrb[27].mxu1  ;;  %v1131_v38 = vrot.slane %v2113_v25, %v1944_v18  ;;  %v1767_v18 = vld [vmem:[%s2204_s5 + $0x8] sm:$0xff]  }
 0x595   :  { %v976_v42 = vpop.f32.mrb[16].mxu0 }
 0x596   :  { %v982_v45 = vmul.f32 %v1791_v41, %v976_v42  ;;  %v1694_v46 = vpop.f32.mrb[17].mxu0  ;;  %v1766_v42 = vld [vmem:[%s2204_s5] sm:$0xff]  }
 0x597   :  { %v979_v47 = vpop.f32.mrb[18].mxu0  ;;  %1717 = vmatpush3.bf16.msra.mxu0 %v1766_v42  ;;  %v1770_v46 = vld [vmem:[%s2204_s5 + $0x20] sm:$0xff]  }
 0x598   :  { %v983_v48 = vpack.c.bf16 %v982_v45, %v845_v43  ;;  %v1695_v50 = vpop.f32.mrb[19].mxu0  ;;  %1718 = vmatprep.subr.bf16.mxu0 %v1828_v1  ;;  %v1768_v43 = vld [vmem:[%s2204_s5 + $0x10] sm:$0xff]   ;;  %v1769_v45 = vld [vmem:[%s2204_s5 + $0x18] sm:$0xff]   ;;  %v1771_v47 = vld [vmem:[%s2204_s5 + $0x28] sm:$0xff]  }
 0x599   :  { %v1773_v50 = vld [vmem:[%s2204_s5 + $0x38] sm:$0xff]  }
 0x59a   :  { %1699 = vmatmul.mubr.msk.bf16.vlgmr.msra.gmra.mrb[28].mxu1 %vm229_vm2, %v983_v48  ;;  %v1772_v48 = vld [vmem:[%s2204_s5 + $0x30] sm:$0xff]  }
 0x59b   :  { %1712 = vmatprep.mubr.msk.bf16.mxu1 %vm1829_vm0, %v1828_v1  ;;  %1719 = vmatpush3.bf16.msra.mxu0 %v1767_v18 }
 0x59c   :  { %1720 = vmatprep.subr.bf16.mxu0 %v1828_v1 }
 0x59d   :  { %v1080_v51 = vpop.f32.mrb[20].mxu0 }
 0x59e   :  { %v1706_v52 = vpop.f32.mrb[21].mxu0 }
 0x59f   :  { %v1083_v53 = vpop.f32.mrb[22].mxu0  ;;  %1721 = vmatpush3.bf16.msra.mxu0 %v1768_v43 }
 0x5a0   :  { %v1707_v55 = vpop.f32.mrb[23].mxu0  ;;  %1722 = vmatprep.subr.bf16.mxu0 %v1828_v1 }
 0x5a3   :  { %1723 = vmatpush3.bf16.msra.mxu0 %v1769_v45 }
 0x5a4   :  { %1724 = vmatprep.subr.bf16.mxu0 %v1828_v1 }
 0x5a7   :  { %1725 = vmatpush3.bf16.msra.mxu0 %v1770_v46 }
 0x5a8   :  { %1726 = vmatprep.subr.bf16.mxu0 %v1828_v1 }
 0x5ab   :  { %1727 = vmatpush3.bf16.msra.mxu0 %v1771_v47 }
 0x5ac   :  { %1728 = vmatprep.subr.bf16.mxu0 %v1828_v1 }
 0x5af   :  { %1729 = vmatpush3.bf16.msra.mxu0 %v1772_v48  ;;  %v1358_v48 = vrot.slane %v2113_v25, %v592_v22 }
 0x5b0   :  { %1730 = vmatprep.subr.bf16.mxu0 %v1828_v1 }
 0x5b3   :  { %1731 = vmatpush3.bf16.msra.mxu0 %v1773_v50 }
 0x66d   :  { %v1030_v58 = vpop.f32.mrb[28].mxu1 }
 0x66e   :  { %v1081_v59 = vadd.f32 %v1080_v51, %v1030_v58  ;;  %v1700_v60 = vpop.f32.mrb[29].mxu1  ;;  %v1142_v51 = vrot.slane %v2113_v25, %v530_v28 }
 0x66f   :  { %v1033_v61 = vpop.f32.mrb[30].mxu1 }
 0x670   :  { %v1091_v62 = vadd.f32 %v1090_v57, %v1081_v59  ;;  %v1084_v63 = vadd.f32 %v1083_v53, %v1033_v61  ;;  %v1701_v0 = vpop.f32.mrb[31].mxu1 }
 0x672   :  { %v1092_v6 = vadd.f32 %v1090_v57, %v1084_v63  ;;  %v1093_v7 = vadd.f32 %v1091_v62, %v1892_v3 }
 0x674   :  { %v1095_v8 = vsel %vm58_vm1, %v1093_v7, 0.0  ;;  %v1094_v9 = vadd.f32 %v1092_v6, %v1897_v4  ;;  %v1764_v4 = vld [vmem:[%s2203_s4] sm:$0xff]  }
 0x675   :  { %1096 = vadd.xlane.f32.xlu0 %v1095_v8  ;;  %1709 = vmatpush3.bf16.msra.mxu1 %v1764_v4 }
 0x676   :  { %v1098_v10 = vsel %vm58_vm1, %v1094_v9, 0.0  ;;  %1710 = vmatprep.subr.bf16.mxu1 %v1828_v1 }
 0x677   :  { %1099 = vadd.xlane.f32.xlu1 %v1098_v10 }
 0x679   :  { %1711 = vmatpush3.bf16.msra.mxu1 %v1765_v24 }
 0x67a   :  { %1736 = vmatprep.subr.bf16.mxu1 %v1828_v1 }
 0x702   :  { %v1097_v12 = vpop.xlane.xlu0 %1096 }
 0x703   :  { %v1102_v13 = vmul.f32 0.03125, %v1097_v12 }
 0x704   :  { %v1100_v15 = vpop.xlane.xlu1 %1099 }
 0x705   :  { %v1104_v16 = vsub.f32 %v1093_v7, %v1102_v13  ;;  %v1103_v19 = vmul.f32 0.03125, %v1100_v15 }
 0x707   :  { %v1105_v54 = vsub.f32 %v1094_v9, %v1103_v19  ;;  %v1106_v21 = vmul.f32 %v1104_v16, %v1104_v16 }
 0x709   :  { %v1108_v49 = vsel %vm58_vm1, %v1106_v21, 0.0  ;;  %v1107_v23 = vmul.f32 %v1105_v54, %v1105_v54 }
 0x70a   :  { %1109 = vadd.xlane.f32.xlu0 %v1108_v49  ;;  %v1237_v49 = vrot.slane %v2113_v25, %v110_v14 }
 0x70b   :  { %v1111_v3 = vsel %vm58_vm1, %v1107_v23, 0.0 }
 0x70c   :  { %1112 = vadd.xlane.f32.xlu1 %v1111_v3 }
 0x797   :  { %v1110_v26 = vpop.xlane.xlu0 %1109 }
 0x798   :  { %v1114_v2 = vmul.f32 0.03125, %v1110_v26 }
 0x799   :  { %v1113_v27 = vpop.xlane.xlu1 %1112 }
 0x79a   :  { %v1116_v5 = vadd.f32 1e-12, %v1114_v2  ;;  %v1115_v30 = vmul.f32 0.03125, %v1113_v27 }
 0x79c   :  { %1792 = vrsqrt.f32 %v1116_v5  ;;  %v1117_v31 = vadd.f32 1e-12, %v1115_v30 }
 0x79e   :  { %1794 = vrsqrt.f32 %v1117_v31 }
 0x7a6   :  { %v1793_v34 = vpop.eup %1792 }
 0x7a7   :  { %v1120_v20 = vmul.f32 %v1793_v34, %v1104_v16 }
 0x7a8   :  { %v1795_v35 = vpop.eup %1794 }
 0x7a9   :  { %v1126_v36 = vmul.f32 %v1125_v33, %v1120_v20  ;;  %v1121_v37 = vmul.f32 %v1795_v35, %v1105_v54 }
 0x7ab   :  { %v1127_v39 = vmul.f32 %v1125_v33, %v1121_v37  ;;  %v2117_v40 = vadd.f32 %v1131_v38, %v1126_v36 }
 0x7ad   :  { %v2119_v41 = vadd.f32 %v1131_v38, %v1127_v39 }
 0x7af   :  { %v1134_v17 = vpack.c.bf16 %v2119_v41, %v2117_v40 }
 0x7b1   :  { %1713 = vmatmul.mubr.msk.bf16.vlgmr.msra.gmra.mrb[32].mxu1 %vm58_vm1, %v1134_v17 }
 0x7b2   :  { %1740 = vmatprep.mubr.msk.bf16.mxu1 %vm1829_vm0, %v1828_v1 }
 0x884   :  { %v1192_v52 = vpop.f32.mrb[32].mxu1 }
 0x885   :  { %v1193_v53 = vadd.f32 %v1192_v52, %v1142_v51  ;;  %v1714_v55 = vpop.f32.mrb[33].mxu1  ;;  %v1364_v52 = vrot.slane %v2113_v25, %v172_v29 }
 0x886   :  { %v1195_v56 = vpop.f32.mrb[34].mxu1 }
 0x887   :  { %v1199_v57 = vmul.f32 %v1193_v53, %v1193_v53  ;;  %v1196_v58 = vadd.f32 %v1195_v56, %v1142_v51  ;;  %v1715_v59 = vpop.f32.mrb[35].mxu1 }
 0x889   :  { %v1201_v60 = vmul.f32 %v1199_v57, %v1193_v53  ;;  %v1200_v61 = vmul.f32 %v1196_v58, %v1196_v58 }
 0x88b   :  { %v1203_v62 = vmul.f32 0.044715, %v1201_v60  ;;  %v1202_v63 = vmul.f32 %v1200_v61, %v1196_v58  ;;  %v1830_v61 = vmov 1966171168  }
 0x88d   :  { %v1205_v0 = vadd.f32 %v1203_v62, %v1193_v53  ;;  %v1204_v6 = vmul.f32 0.044715, %v1202_v63  ;;  %v1438_v62 = vunpack.c.l.s4 %v1830_v61  ;;  %v1380_v63 = vrot.slane %v2113_v25, %v654_v44 }
 0x88f   :  { %v1207_v7 = vmul.f32 0.7978846, %v1205_v0  ;;  %v1206_v8 = vadd.f32 %v1204_v6, %v1196_v58  ;;  %v1439_v22 = vunpack.c.0.s8 %v1438_v62 }
 0x891   :  { %1796 = vtanh.f32 %v1207_v7  ;;  %v1208_v9 = vmul.f32 0.7978846, %v1206_v8  ;;  %v1442_v0 = vsub.s32 %v1439_v22, %v1935_v11 }
 0x893   :  { %1798 = vtanh.f32 %v1208_v9 }
 0x89b   :  { %v1797_v10 = vpop.eup %1796 }
 0x89c   :  { %v1211_v28 = vadd.f32 1.0, %v1797_v10 }
 0x89d   :  { %v1799_v12 = vpop.eup %1798 }
 0x89e   :  { %v1213_v13 = vmul.f32 0.5, %v1211_v28  ;;  %v1212_v15 = vadd.f32 1.0, %v1799_v12 }
 0x8a0   :  { %v1214_v16 = vmul.f32 0.5, %v1212_v15  ;;  %v1215_v19 = vmul.f32 %v1213_v13, %v1193_v53 }
 0x8a2   :  { %v1216_v54 = vmul.f32 %v1214_v16, %v1196_v58 }
 0x8a4   :  { %v1217_v21 = vpack.c.bf16 %v1216_v54, %v1215_v19 }
 0x8a6   :  { %1733 = vmatmul.mubr.bf16.vlgmr.msra.gmra.mrb[24].mxu0 %v1217_v21 }
 0x979   :  { %v1320_v23 = vpop.f32.mrb[24].mxu0 }
 0x97a   :  { %v1321_v3 = vadd.f32 %v1320_v23, %v1237_v49  ;;  %v1734_v4 = vpop.f32.mrb[25].mxu0 }
 0x97b   :  { %v1323_v24 = vpop.f32.mrb[26].mxu0 }
 0x97c   :  { %v1324_v26 = vadd.f32 %v1323_v24, %v1237_v49  ;;  %v1735_v2 = vpop.f32.mrb[27].mxu0  ;;  %v1327_v27 = vadd.f32 %v1321_v3, %v2117_v40  ;;  %v1774_v40 = vld [vmem:[%s2205_s6] sm:$0xff]  }
 0x97d   :  { %1737 = vmatpush3.bf16.msra.mxu1 %v1774_v40 }
 0x97e   :  { %v1329_v5 = vsel %vm58_vm1, %v1327_v27, 0.0  ;;  %v1328_v30 = vadd.f32 %v1324_v26, %v2119_v41  ;;  %1738 = vmatprep.subr.bf16.mxu1 %v1828_v1  ;;  %v1775_v41 = vld [vmem:[%s2205_s6 + $0x8] sm:$0xff]   ;;  %s1831_s6 = smov [#allocation2]  }
 0x97f   :  { %1330 = vadd.xlane.f32.xlu1 %v1329_v5  ;;  %s1468_s15 = sshll.u32 %s1831_s6, 4  ;;  %s1469_s15 = int_to_ptr.vmem [resolvable:$true] %s1468_s15 }
 0x980   :  { %v1332_v31 = vsel %vm58_vm1, %v1328_v30, 0.0  ;;  %s1804_s16 = scalar_lea.vmem %s1469_s15, 32  ;;  %p1809_p1 = scmp.lt.s32.totalorder %s1469_s15, %s1469_s15 }
 0x981   :  { %1333 = vadd.xlane.f32.xlu0 %v1332_v31  ;;  %1739 = vmatpush3.bf16.msra.mxu1 %v1775_v41  ;;  %p1805_p0 = scmp.ne.s32.totalorder %s1469_s15, %s1804_s16  ;;  %p1810_p2 = scmp.lt.s32.totalorder %s1804_s16, %s1804_s16 }
 0x983   :  { %p1811_p3 = por %p1810_p2, %p1809_p1 }
 0x985   :  { %p1812_p4 = pnand %p1811_p3, %p1805_p0 }
 0xa0c   :  { %v1331_v32 = vpop.xlane.xlu1 %1330 }
 0xa0d   :  { %v1335_v33 = vmul.f32 0.03125, %v1331_v32 }
 0xa0e   :  { %v1334_v34 = vpop.xlane.xlu0 %1333 }
 0xa0f   :  { %v1337_v14 = vsub.f32 %v1327_v27, %v1335_v33  ;;  %v1336_v20 = vmul.f32 0.03125, %v1334_v34 }
 0xa11   :  { %v1338_v35 = vsub.f32 %v1328_v30, %v1336_v20  ;;  %v1339_v36 = vmul.f32 %v1337_v14, %v1337_v14 }
 0xa13   :  { %v1341_v37 = vsel %vm58_vm1, %v1339_v36, 0.0  ;;  %v1340_v38 = vmul.f32 %v1338_v35, %v1338_v35 }
 0xa14   :  { %1342 = vadd.xlane.f32.xlu1 %v1341_v37 }
 0xa15   :  { %v1344_v39 = vsel %vm58_vm1, %v1340_v38, 0.0 }
 0xa16   :  { %1345 = vadd.xlane.f32.xlu0 %v1344_v39 }
 0xaa1   :  { %v1343_v17 = vpop.xlane.xlu1 %1342 }
 0xaa2   :  { %v1347_v42 = vmul.f32 0.03125, %v1343_v17 }
 0xaa3   :  { %v1346_v18 = vpop.xlane.xlu0 %1345 }
 0xaa4   :  { %v1349_v43 = vadd.f32 1e-12, %v1347_v42  ;;  %v1348_v45 = vmul.f32 0.03125, %v1346_v18 }
 0xaa6   :  { %1800 = vrsqrt.f32 %v1349_v43  ;;  %v1350_v46 = vadd.f32 1e-12, %v1348_v45 }
 0xaa8   :  { %1802 = vrsqrt.f32 %v1350_v46 }
 0xab0   :  { %v1801_v47 = vpop.eup %1800 }
 0xab1   :  { %v1353_v50 = vmul.f32 %v1801_v47, %v1337_v14 }
 0xab2   :  { %v1803_v1 = vpop.eup %1802 }
 0xab3   :  { %v1354_v51 = vmul.f32 %v1803_v1, %v1338_v35  ;;  %v1359_v53 = vmul.f32 %v1358_v48, %v1353_v50 }
 0xab5   :  { %v1360_v55 = vmul.f32 %v1358_v48, %v1354_v51  ;;  %v1365_v57 = vadd.f32 %v1364_v52, %v1359_v53 }
 0xab7   :  { %v1366_v56 = vadd.f32 %v1364_v52, %v1360_v55 }
 0xab9   :  { %v1368_v58 = vrot.slane %v1366_v56, 7 }
 0xabb   :  { %v1371_v59 = vsel %vm1370_vm5, %v1365_v57, %v1368_v58 }
 0xabc   :  { %v1372_v60 = vpack.c.bf16 %v1371_v59, %v1371_v59 }
 0xabe   :  { %1741 = vmatmul.mubr.msk.bf16.vlgmr.msra.gmra.mrb[36].mxu1 %vm58_vm1, %v1372_v60 }
 0xb91   :  { %v1430_v29 = vpop.f32.mrb[36].mxu1 }
 0xb92   :  { %v1431_v6 = vadd.f32 %v1430_v29, %v1380_v63  ;;  %v1742_v7 = vpop.f32.mrb[37].mxu1 }
 0xb93   :  { %v1433_v8 = vpop.f32.mrb[38].mxu1 }
 0xb94   :  { %v1443_v9 = vrot.slane %v1431_v6, %v1442_v0  ;;  %v1743_v10 = vpop.f32.mrb[39].mxu1 }
 0xb96   :  { %v1444_v28 = vcombine.high %v1443_v9, %v1443_v9  ;;  %1549 = vst.sshfl [vmem:[#allocation2] sm:$0x1 pattern:$0x73625140] %v1443_v9 }
 0xb98   :  { %1550 = vst.sshfl [vmem:[#allocation2 + $0x1] sm:$0x1 pattern:$0x73625140] %v1444_v28 }
 0xb99   :  { %1815 = shalt.err (!%p1812_p4)
}
 0xb9a   :  { %s1816_s17 = scalar_lea.hbm %s2207_s8, 32 }
 0xb9b   :  { %p1817_p5 = scmp.ne.s32.totalorder %s2207_s8, %s1816_s17  ;;  %p1820_p6 = scmp.lt.u32.totalorder %s1816_s17, %s2207_s8 }
 0xb9d   :  { %p1822_p7 = pnand %p1820_p6, %p1817_p5 }
 0xb9f   :  { %1825 = shalt.err (!%p1822_p7)
}
 0xba0   :  { %s1832_s7 = smov 16   ;;  %s1833_s21 = smov 1  }
 0xba1   :  { %1474 = dma.vmem_to_hbm [thread:$0]  %s1469_s15, 32, %s2207_s8, [#allocation3], %s1832_s7, %s1832_s7, %s1833_s21  }
 0xba2   :  { %1826 = dma.done.wait [#allocation3], 32  }
 0xba3   :  { %1827 = vsyncadd [#allocation3], 4294967264 }
 0xba4   :  { %1478 = vsyncpa [#allocation3], 1 }

</bundles_post_ra>
